<compile_context>
chip_gen: v7x
topology: tpu7x:2x2x1
jax: 0.10.0
libtpu: 0.0.40
codegen_flags: <defaults>
</compile_context>

<pallas_src>
import functools

import jax
import jax.numpy as jnp
from jax.experimental import pallas as pl
from jax.experimental.pallas import tpu as pltpu

# Logical layer sizes (PyTorch Net): 784 -> 392 -> 196 -> 98 -> 10
SIZES = [(28 * 28, 392), (392, 196), (196, 98), (98, 10)]
# Lane-padded widths (multiples of 128) for each layer input / output.
PADDED_IN = [28 * 28, 512, 256, 128]
PADDED_OUT = [512, 256, 128, 128]
NUM_CLASSES = 10


def _round_up(x, m):
    return (x + m - 1) // m * m


# ---------------------------------------------------------------------------
# Fused forward kernel: one grid step = one batch tile through all 4 layers.
# ---------------------------------------------------------------------------
def _fused_mlp_kernel(x_ref, w1, b1, w2, b2, w3, b3, w4, b4, o_ref):
    # Activations stay f32; matmuls run as bf16 MXU passes with f32 accumulate.
    h = x_ref[...]  # (tb, 784) f32
    layers = ((w1, b1, True), (w2, b2, True), (w3, b3, True), (w4, b4, False))
    for w_ref, b_ref, relu in layers:  # statically unrolled at trace time
        y = jnp.dot(h.astype(jnp.bfloat16), w_ref[...],
                    preferred_element_type=jnp.float32)
        y = y + b_ref[...]            # (1, N) broadcast over batch, f32
        if relu:
            y = jnp.maximum(y, 0.0)
        h = y
    o_ref[...] = h.astype(o_ref.dtype)


def _fused_forward(x_pad, params_pad, *, block_b):
    """x_pad: (Bp, 784) f32, Bp % block_b == 0. Returns (Bp, 128) f32."""
    Bp, K = x_pad.shape
    assert K == PADDED_IN[0] and Bp % block_b == 0
    n_out = PADDED_OUT[-1]

    flat_params = []
    param_specs = []
    for w, b in params_pad:
        flat_params += [w, b]
        # Whole-array blocks; constant index_map -> weights stay VMEM-resident
        # across all batch-tile grid steps (loaded from HBM once).
        param_specs.append(pl.BlockSpec(w.shape, lambda i: (0, 0)))
        param_specs.append(pl.BlockSpec(b.shape, lambda i: (0, 0)))

    flops = 2 * Bp * sum(k_in * k_out for k_in, k_out in SIZES)
    bytes_accessed = (
        x_pad.size * x_pad.dtype.itemsize
        + sum(a.size * a.dtype.itemsize for a in flat_params)
        + Bp * n_out * 4
    )

    return pl.pallas_call(
        _fused_mlp_kernel,
        out_shape=jax.ShapeDtypeStruct((Bp, n_out), jnp.float32),
        grid=(Bp // block_b,),
        in_specs=[pl.BlockSpec((block_b, K), lambda i: (i, 0))] + param_specs,
        out_specs=pl.BlockSpec((block_b, n_out), lambda i: (i, 0)),
        compiler_params=pltpu.CompilerParams(
            dimension_semantics=("parallel",)),
        cost_estimate=pl.CostEstimate(
            flops=flops, transcendentals=0, bytes_accessed=bytes_accessed),
    )(x_pad, *flat_params)


@jax.jit
def net_forward(x, params_pad):
    """x: (B, 784) f32; params_pad: list of (w_bf16_padded, b_f32_padded)."""
    B, K = x.shape
    assert K == PADDED_IN[0]
    # Batch tile: 128 rows for big batches (megacore-shardable on v7x),
    # otherwise a single 8-row-aligned tile.
    block_b = 128 if B >= 128 else _round_up(max(B, 1), 8)
    Bp = _round_up(B, block_b)
    x_pad = x if Bp == B else jnp.pad(x, ((0, Bp - B), (0, 0)))
    out_pad = _fused_forward(x_pad, params_pad, block_b=block_b)
    return out_pad[:B, :NUM_CLASSES]


# ---------------------------------------------------------------------------
# Parameter construction (PyTorch nn.Linear-style init) + lane padding.
# ---------------------------------------------------------------------------
def init_params(key, dtype=jnp.float32):
    """Deterministic synthetic parameters at the LOGICAL (unpadded) shapes.

    Weights are [in_features, out_features] (transpose of torch's [out, in]);
    bias is [1, out_features]."""
    params = []
    for i, (fan_in, fan_out) in enumerate(SIZES):
        kw, kb, key = jax.random.split(jax.random.fold_in(key, i), 3)
        bound = 1.0 / jnp.sqrt(jnp.float32(fan_in))
        w = jax.random.uniform(kw, (fan_in, fan_out), dtype, -bound, bound)
        b = jax.random.uniform(kb, (1, fan_out), dtype, -bound, bound)
        params.append((w, b))
    return params


def pad_params(params_logical):
    """Zero-pad to lane-dense shapes; weights -> bf16, biases stay f32."""
    padded = []
    for (w, b), k_pad, n_pad in zip(params_logical, PADDED_IN, PADDED_OUT):
        k, n = w.shape
        w_p = jnp.zeros((k_pad, n_pad), jnp.float32).at[:k, :n].set(w)
        b_p = jnp.zeros((1, n_pad), jnp.float32).at[:, :n].set(b)
        padded.append((w_p.astype(jnp.bfloat16), b_p))
    return padded


# ---------------------------------------------------------------------------
# Plain-JAX references.
# ---------------------------------------------------------------------------
def reference_forward(x, params_logical, use_bf16):
    h = x
    for i, (w, b) in enumerate(params_logical):
        if use_bf16:
            y = jnp.dot(h.astype(jnp.bfloat16), w.astype(jnp.bfloat16),
                        preferred_element_type=jnp.float32)
        else:
            y = jnp.dot(h, w, preferred_element_type=jnp.float32)
        y = y + b
        if i < len(params_logical) - 1:
            y = jnp.maximum(y, 0.0)
        h = y
    return h


if __name__ == "__main__":
    key = jax.random.PRNGKey(0)
    kx, kp = jax.random.split(key)

    batch = 2
    x = jax.random.normal(kx, (batch, 28 * 28), dtype=jnp.float32)

    params_logical = init_params(kp)
    params_padded = pad_params(params_logical)

    out = net_forward(x, params_padded)
    jax.block_until_ready(out)
    assert out.shape == (batch, NUM_CLASSES)

    # Tight check vs a reference that uses the same bf16-weight matmuls.
    ref_bf16 = reference_forward(x, params_logical, use_bf16=True)
    assert jnp.allclose(out, ref_bf16, atol=1e-3, rtol=1e-3), (
        jnp.max(jnp.abs(out - ref_bf16)))

    # Looser sanity check vs the pure-f32 reference.
    ref_f32 = reference_forward(x, params_logical, use_bf16=False)
    assert jnp.allclose(out, ref_f32, atol=5e-2, rtol=5e-2), (
        jnp.max(jnp.abs(out - ref_f32)))

    print("KERNEL_OK")
</pallas_src>

<mosaic_0001>
module attributes {stable_mosaic.version = 11 : i64} {
  func.func @_fused_mlp_kernel(%arg0: i32, %arg1: memref<8x784xf32, #tpu.memory_space<vmem>>, %arg2: memref<784x512xbf16, #tpu.memory_space<vmem>>, %arg3: memref<1x512xf32, #tpu.memory_space<vmem>>, %arg4: memref<512x256xbf16, #tpu.memory_space<vmem>>, %arg5: memref<1x256xf32, #tpu.memory_space<vmem>>, %arg6: memref<256x128xbf16, #tpu.memory_space<vmem>>, %arg7: memref<1x128xf32, #tpu.memory_space<vmem>>, %arg8: memref<128x128xbf16, #tpu.memory_space<vmem>>, %arg9: memref<1x128xf32, #tpu.memory_space<vmem>>, %arg10: memref<8x128xf32, #tpu.memory_space<vmem>>) attributes {dimension_semantics = [#tpu.dimension_semantics<parallel>], iteration_bounds = array<i64: 1>, scalar_prefetch = 0 : i64, scratch_operands = 0 : i64, tpu.core_type = #tpu.core_type<tc>, window_params = [{transform_indices = @transform_0, window_bounds = array<i64: 8, 784>}, {pipeline_mode = #tpu.pipeline_mode<synchronous>, transform_indices = @transform_1, window_bounds = array<i64: 784, 512>}, {pipeline_mode = #tpu.pipeline_mode<synchronous>, transform_indices = @transform_2, window_bounds = array<i64: 1, 512>}, {pipeline_mode = #tpu.pipeline_mode<synchronous>, transform_indices = @transform_3, window_bounds = array<i64: 512, 256>}, {pipeline_mode = #tpu.pipeline_mode<synchronous>, transform_indices = @transform_4, window_bounds = array<i64: 1, 256>}, {pipeline_mode = #tpu.pipeline_mode<synchronous>, transform_indices = @transform_5, window_bounds = array<i64: 256, 128>}, {pipeline_mode = #tpu.pipeline_mode<synchronous>, transform_indices = @transform_6, window_bounds = array<i64: 1, 128>}, {pipeline_mode = #tpu.pipeline_mode<synchronous>, transform_indices = @transform_7, window_bounds = array<i64: 128, 128>}, {pipeline_mode = #tpu.pipeline_mode<synchronous>, transform_indices = @transform_8, window_bounds = array<i64: 1, 128>}, {transform_indices = @transform_9, window_bounds = array<i64: 8, 128>}]} {
    %c0 = arith.constant 0 : index
    %c0_0 = arith.constant 0 : index
    %0 = vector.load %arg1[%c0, %c0_0] : memref<8x784xf32, #tpu.memory_space<vmem>>, vector<8x784xf32>
    %1 = arith.truncf %0 : vector<8x784xf32> to vector<8x784xbf16>
    %c0_1 = arith.constant 0 : index
    %c0_2 = arith.constant 0 : index
    %2 = vector.load %arg2[%c0_1, %c0_2] : memref<784x512xbf16, #tpu.memory_space<vmem>>, vector<784x512xbf16>
    %cst = arith.constant dense<0.000000e+00> : vector<8x512xf32>
    %3 = tpu.matmul %1, %2, %cst {dimension_numbers = #tpu.dot_dimension_numbers<[1], [0], [0], [1], [0, 0, 1, 1], [], []>} : vector<8x784xbf16>, vector<784x512xbf16>, vector<8x512xf32> -> vector<8x512xf32>
    %c0_3 = arith.constant 0 : index
    %c0_4 = arith.constant 0 : index
    %4 = vector.load %arg3[%c0_3, %c0_4] : memref<1x512xf32, #tpu.memory_space<vmem>>, vector<1x512xf32>
    %5 = vector.broadcast %4 : vector<1x512xf32> to vector<8x512xf32>
    %6 = arith.addf %3, %5 : vector<8x512xf32>
    %cst_5 = arith.constant 0.000000e+00 : f32
    %7 = vector.broadcast %cst_5 : f32 to vector<8x512xf32>
    %8 = arith.maximumf %6, %7 : vector<8x512xf32>
    %9 = arith.truncf %8 : vector<8x512xf32> to vector<8x512xbf16>
    %c0_6 = arith.constant 0 : index
    %c0_7 = arith.constant 0 : index
    %10 = vector.load %arg4[%c0_6, %c0_7] : memref<512x256xbf16, #tpu.memory_space<vmem>>, vector<512x256xbf16>
    %cst_8 = arith.constant dense<0.000000e+00> : vector<8x256xf32>
    %11 = tpu.matmul %9, %10, %cst_8 {dimension_numbers = #tpu.dot_dimension_numbers<[1], [0], [0], [1], [0, 0, 1, 1], [], []>} : vector<8x512xbf16>, vector<512x256xbf16>, vector<8x256xf32> -> vector<8x256xf32>
    %c0_9 = arith.constant 0 : index
    %c0_10 = arith.constant 0 : index
    %12 = vector.load %arg5[%c0_9, %c0_10] : memref<1x256xf32, #tpu.memory_space<vmem>>, vector<1x256xf32>
    %13 = vector.broadcast %12 : vector<1x256xf32> to vector<8x256xf32>
    %14 = arith.addf %11, %13 : vector<8x256xf32>
    %cst_11 = arith.constant 0.000000e+00 : f32
    %15 = vector.broadcast %cst_11 : f32 to vector<8x256xf32>
    %16 = arith.maximumf %14, %15 : vector<8x256xf32>
    %17 = arith.truncf %16 : vector<8x256xf32> to vector<8x256xbf16>
    %c0_12 = arith.constant 0 : index
    %c0_13 = arith.constant 0 : index
    %18 = vector.load %arg6[%c0_12, %c0_13] : memref<256x128xbf16, #tpu.memory_space<vmem>>, vector<256x128xbf16>
    %cst_14 = arith.constant dense<0.000000e+00> : vector<8x128xf32>
    %19 = tpu.matmul %17, %18, %cst_14 {dimension_numbers = #tpu.dot_dimension_numbers<[1], [0], [0], [1], [0, 0, 1, 1], [], []>} : vector<8x256xbf16>, vector<256x128xbf16>, vector<8x128xf32> -> vector<8x128xf32>
    %c0_15 = arith.constant 0 : index
    %c0_16 = arith.constant 0 : index
    %20 = vector.load %arg7[%c0_15, %c0_16] : memref<1x128xf32, #tpu.memory_space<vmem>>, vector<1x128xf32>
    %21 = vector.broadcast %20 : vector<1x128xf32> to vector<8x128xf32>
    %22 = arith.addf %19, %21 : vector<8x128xf32>
    %cst_17 = arith.constant 0.000000e+00 : f32
    %23 = vector.broadcast %cst_17 : f32 to vector<8x128xf32>
    %24 = arith.maximumf %22, %23 : vector<8x128xf32>
    %25 = arith.truncf %24 : vector<8x128xf32> to vector<8x128xbf16>
    %c0_18 = arith.constant 0 : index
    %c0_19 = arith.constant 0 : index
    %26 = vector.load %arg8[%c0_18, %c0_19] : memref<128x128xbf16, #tpu.memory_space<vmem>>, vector<128x128xbf16>
    %cst_20 = arith.constant dense<0.000000e+00> : vector<8x128xf32>
    %27 = tpu.matmul %25, %26, %cst_20 {dimension_numbers = #tpu.dot_dimension_numbers<[1], [0], [0], [1], [0, 0, 1, 1], [], []>} : vector<8x128xbf16>, vector<128x128xbf16>, vector<8x128xf32> -> vector<8x128xf32>
    %c0_21 = arith.constant 0 : index
    %c0_22 = arith.constant 0 : index
    %28 = vector.load %arg9[%c0_21, %c0_22] : memref<1x128xf32, #tpu.memory_space<vmem>>, vector<1x128xf32>
    %29 = vector.broadcast %28 : vector<1x128xf32> to vector<8x128xf32>
    %30 = arith.addf %27, %29 : vector<8x128xf32>
    %c0_23 = arith.constant 0 : index
    %c0_24 = arith.constant 0 : index
    %31 = vector.load %arg10[%c0_23, %c0_24] : memref<8x128xf32, #tpu.memory_space<vmem>>, vector<8x128xf32>
    tpu.vector_store %arg10[%c0_23, %c0_24], %30 {strides = array<i32>} : memref<8x128xf32, #tpu.memory_space<vmem>>, vector<8x128xf32>,
    return
  }
  func.func @transform_0(%arg0: i32) -> (i32, i32) {
    %c0_i32 = arith.constant 0 : i32
    %c0_i32_0 = arith.constant 0 : i32
    return %arg0, %c0_i32 : i32, i32
  }
  func.func @transform_1(%arg0: i32) -> (i32, i32) {
    %c0_i32 = arith.constant 0 : i32
    %c0_i32_0 = arith.constant 0 : i32
    %c0_i32_1 = arith.constant 0 : i32
    return %c0_i32, %c0_i32_0 : i32, i32
  }
  func.func @transform_2(%arg0: i32) -> (i32, i32) {
    %c0_i32 = arith.constant 0 : i32
    %c0_i32_0 = arith.constant 0 : i32
    %c0_i32_1 = arith.constant 0 : i32
    return %c0_i32, %c0_i32_0 : i32, i32
  }
  func.func @transform_3(%arg0: i32) -> (i32, i32) {
    %c0_i32 = arith.constant 0 : i32
    %c0_i32_0 = arith.constant 0 : i32
    %c0_i32_1 = arith.constant 0 : i32
    return %c0_i32, %c0_i32_0 : i32, i32
  }
  func.func @transform_4(%arg0: i32) -> (i32, i32) {
    %c0_i32 = arith.constant 0 : i32
    %c0_i32_0 = arith.constant 0 : i32
    %c0_i32_1 = arith.constant 0 : i32
    return %c0_i32, %c0_i32_0 : i32, i32
  }
  func.func @transform_5(%arg0: i32) -> (i32, i32) {
    %c0_i32 = arith.constant 0 : i32
    %c0_i32_0 = arith.constant 0 : i32
    %c0_i32_1 = arith.constant 0 : i32
    return %c0_i32, %c0_i32_0 : i32, i32
  }
  func.func @transform_6(%arg0: i32) -> (i32, i32) {
    %c0_i32 = arith.constant 0 : i32
    %c0_i32_0 = arith.constant 0 : i32
    %c0_i32_1 = arith.constant 0 : i32
    return %c0_i32, %c0_i32_0 : i32, i32
  }
  func.func @transform_7(%arg0: i32) -> (i32, i32) {
    %c0_i32 = arith.constant 0 : i32
    %c0_i32_0 = arith.constant 0 : i32
    %c0_i32_1 = arith.constant 0 : i32
    return %c0_i32, %c0_i32_0 : i32, i32
  }
  func.func @transform_8(%arg0: i32) -> (i32, i32) {
    %c0_i32 = arith.constant 0 : i32
    %c0_i32_0 = arith.constant 0 : i32
    %c0_i32_1 = arith.constant 0 : i32
    return %c0_i32, %c0_i32_0 : i32, i32
  }
  func.func @transform_9(%arg0: i32) -> (i32, i32) {
    %c0_i32 = arith.constant 0 : i32
    %c0_i32_0 = arith.constant 0 : i32
    return %arg0, %c0_i32 : i32, i32
  }
}

</mosaic_0001>

<bundles_post_ra>
// kernel: net_forward.1
= control target key start
LH: loop header
LB: loop body
LE: loop exit
PB: predicated region body
PF: predicated region fallthrough
CT: control target
= control target key end

     0   :  { %14 = vsyncpa [#allocation3], 0  ;;  %s3462_s0 = inlined_call_operand.vmem [shape: f32[8,784], index: 0, kind: input, shape index: {}]   ;;  %s3463_s1 = inlined_call_operand.hbm [shape: bf16[784,512], index: 1, kind: input, shape index: {}]   ;;  %s3464_s2 = inlined_call_operand.vmem [shape: f32[1,512], index: 2, kind: input, shape index: {}]   ;;  %s3465_s3 = inlined_call_operand.hbm [shape: bf16[512,256], index: 3, kind: input, shape index: {}]   ;;  %s3466_s4 = inlined_call_operand.vmem [shape: f32[1,256], index: 4, kind: input, shape index: {}]   ;;  %s3467_s5 = inlined_call_operand.hbm [shape: bf16[256,128], index: 5, kind: input, shape index: {}]   ;;  %s3468_s6 = inlined_call_operand.vmem [shape: f32[1,128], index: 6, kind: input, shape index: {}]   ;;  %s3469_s7 = inlined_call_operand.vmem [shape: bf16[128,128], index: 7, kind: input, shape index: {}]   ;;  %s3470_s8 = inlined_call_operand.vmem [shape: f32[1,128], index: 8, kind: input, shape index: {}]   ;;  %s3471_s9 = inlined_call_operand.vmem [shape: f32[8,128], index: 9, kind: output, shape index: {}]  }
   0x1   :  { %15 = vsyncpa [#allocation5], 0  ;;  %s3270_s30 = smov [#allocation4]   ;;  %s3200_s13 = scalar_lea.hbm %s3465_s3, 8192 }
   0x2   :  { %s37_s10 = sshll.u32 %s3270_s30, 4  ;;  %p3201_p0 = scmp.ne.s32.totalorder %s3465_s3, %s3200_s13  ;;  %s38_s10 = int_to_ptr.vmem [resolvable:$true] %s37_s10 }
   0x3   :  { %p3204_p1 = scmp.lt.u32.totalorder %s3200_s13, %s3465_s3 }
   0x5   :  { %p3206_p2 = pnand %p3204_p1, %p3201_p0 }
   0x7   :  { %3209 = shalt.err (!%p3206_p2)
}
   0x8   :  { %s3210_s18 = scalar_lea.vmem %s38_s10, 8192  ;;  %p3215_p4 = scmp.lt.s32.totalorder %s38_s10, %s38_s10 }
   0x9   :  { %p3211_p3 = scmp.ne.s32.totalorder %s38_s10, %s3210_s18  ;;  %p3216_p5 = scmp.lt.s32.totalorder %s3210_s18, %s3210_s18 }
   0xb   :  { %p3217_p6 = por %p3216_p5, %p3215_p4 }
   0xd   :  { %p3218_p7 = pnand %p3217_p6, %p3211_p3 }
   0xf   :  { %3221 = shalt.err (!%p3218_p7)
}
  0x10   :  { %s3271_s19 = smov 128   ;;  %s3272_s20 = smov 8  }
  0x11   :  { %43 = dma.hbm_to_vmem [thread:$0]  %s3465_s3, 8192, %s38_s10, [#allocation5], %s3271_s19, %s3271_s19, %s3272_s20  }
  0x12   :  { %s3273_s23 = smov [#allocation2]   ;;  %s3222_s27 = scalar_lea.hbm %s3463_s1, 25088 }
  0x13   :  { %s23_s24 = sshll.u32 %s3273_s23, 4  ;;  %p3223_p8 = scmp.ne.s32.totalorder %s3463_s1, %s3222_s27  ;;  %s24_s24 = int_to_ptr.vmem [resolvable:$true] %s23_s24 }
  0x14   :  { %p3226_p9 = scmp.lt.u32.totalorder %s3222_s27, %s3463_s1 }
  0x16   :  { %p3228_p10 = pnand %p3226_p9, %p3223_p8 }
  0x18   :  { %3231 = shalt.err (!%p3228_p10)
}
  0x19   :  { %s3232_s12 = scalar_lea.vmem %s24_s24, 25088  ;;  %p3237_p12 = scmp.lt.s32.totalorder %s24_s24, %s24_s24 }
  0x1a   :  { %p3233_p11 = scmp.ne.s32.totalorder %s24_s24, %s3232_s12  ;;  %p3238_p13 = scmp.lt.s32.totalorder %s3232_s12, %s3232_s12 }
  0x1c   :  { %p3239_p0 = por %p3238_p13, %p3237_p12 }
  0x1e   :  { %p3240_p1 = pnand %p3239_p0, %p3233_p11 }
  0x20   :  { %3243 = shalt.err (!%p3240_p1)
}
  0x21   :  { %s3274_s3 = smov 256   ;;  %s3275_s10 = smov 16  }
  0x22   :  { %29 = dma.hbm_to_vmem [thread:$0]  %s3463_s1, 25088, %s24_s24, [#allocation3], %s3274_s3, %s3274_s3, %s3275_s10  }
  0x23   :  { %s3276_s15 = smov [#allocation6]   ;;  %s3244_s19 = scalar_lea.hbm %s3467_s5, 2048 }
  0x24   :  { %s51_s16 = sshll.u32 %s3276_s15, 4  ;;  %p3245_p2 = scmp.ne.s32.totalorder %s3467_s5, %s3244_s19  ;;  %s52_s16 = int_to_ptr.vmem [resolvable:$true] %s51_s16 }
  0x25   :  { %p3248_p3 = scmp.lt.u32.totalorder %s3244_s19, %s3467_s5 }
  0x27   :  { %p3250_p4 = pnand %p3248_p3, %p3245_p2 }
  0x29   :  { %3253 = shalt.err (!%p3250_p4)
}
  0x2a   :  { %s3254_s25 = scalar_lea.vmem %s52_s16, 2048  ;;  %p3259_p6 = scmp.lt.s32.totalorder %s52_s16, %s52_s16 }
  0x2b   :  { %p3255_p5 = scmp.ne.s32.totalorder %s52_s16, %s3254_s25  ;;  %p3260_p7 = scmp.lt.s32.totalorder %s3254_s25, %s3254_s25 }
  0x2d   :  { %p3261_p8 = por %p3260_p7, %p3259_p6 }
  0x2f   :  { %p3262_p9 = pnand %p3261_p8, %p3255_p5 }
  0x31   :  { %3265 = shalt.err (!%p3262_p9)
}
  0x32   :  { %s3277_s1 = smov 64   ;;  %s3278_s24 = smov 4  }
  0x33   :  { %57 = dma.hbm_to_vmem [thread:$0]  %s3467_s5, 2048, %s52_s16, [#allocation5], %s3277_s1, %s3277_s1, %s3278_s24  }
  0x34   :  { %3266 = dma.done.wait [#allocation3], 25088  }
  0x35   :  { %3267 = vsyncadd [#allocation3], 4294942208 }
  0x36   :  { %3268 = dma.done.wait [#allocation5], 10240  }
  0x37   :  { %3269 = vsyncadd [#allocation5], 4294957056  ;;  %v3279_v0 = vmov 0   ;;  %v2786_v1 = vld [vmem:[#allocation2 + $0x4] ss:$16 sps:$4 sm:$0xff]   ;;  %vm1286_vm0 = vcmask 130048  }
  0x38   :  { %1445 = vmatprep.mubr.bf16.mxu1 %v3279_v0  ;;  %v2788_v2 = vld [vmem:[#allocation2 + $0x604] ss:$16 sps:$4 sm:$0xff]   ;;  %1290 = vmatprep.subr.bf16.mxu0 %v2786_v1  ;;  %v2790_v3 = vld [vmem:[#allocation2] ss:$16 sps:$4 sm:$0xff]   ;;  %v2794_v6 = vld [vmem:[#allocation2 + $0x8] ss:$16 sps:$4 sm:$0xff]  }
  0x39   :  { %v2791_v4 = vld [vmem:[#allocation2 + $0x600] ss:$16 sps:$4 sm:$0xff]   ;;  %1413 = vmatprep.subr.bf16.mxu1 %v2788_v2  ;;  %v2792_v5 = vld [vmem:[#allocation2 + $0x24] ss:$16 sps:$4 sm:$0xff]   ;;  %1291 = vmatpush1.bf16.msra.mxu0 %v2790_v3  ;;  %v2796_v7 = vld [vmem:[#allocation2 + $0xc] ss:$16 sps:$4 sm:$0xff]  }
  0x3a   :  { %1414 = vmatpush1.bf16.msra.mxu1 %v2791_v4  ;;  %1292 = vmatprep.subr.bf16.mxu0 %v2792_v5  ;;  %v2797_v8 = vld [vmem:[#allocation2 + $0x20] ss:$16 sps:$4 sm:$0xff]   ;;  %v2798_v11 = vld [vmem:[#allocation2 + $0x44] ss:$16 sps:$4 sm:$0xff]   ;;  %v2800_v12 = vld [vmem:[#allocation2 + $0x28] ss:$16 sps:$4 sm:$0xff]  }
  0x3b   :  { %v80_v9 = vld [vmem:[%s3462_s0 + $0x30] sm:$0xff]  ;;  %1454 = vmatprep.subr.bf16.mxu1 %v2796_v7  ;;  %v2802_v13 = vld [vmem:[#allocation2 + $0x2c] ss:$16 sps:$4 sm:$0xff]   ;;  %v2806_v18 = vld [vmem:[#allocation2 + $0x48] ss:$16 sps:$4 sm:$0xff]   ;;  %vm3281_vm1 = vmmov 0  }
  0x3c   :  { %v3372_v10 = vpack.c.bf16 %v80_v9, %v80_v9  ;;  %v2803_v14 = vld [vmem:[#allocation2 + $0x40] ss:$16 sps:$4 sm:$0xff]   ;;  %v2804_v15 = vld [vmem:[#allocation2 + $0x64] ss:$16 sps:$4 sm:$0xff]   ;;  %v2808_v16 = vld [vmem:[#allocation2 + $0x4c] ss:$16 sps:$4 sm:$0xff]  }
  0x3d   :  { %1293 = vmatpush1.bf16.msra.mxu0 %v2797_v8  ;;  %v2809_v17 = vld [vmem:[#allocation2 + $0x60] ss:$16 sps:$4 sm:$0xff]   ;;  %v2810_v19 = vld [vmem:[#allocation2 + $0x84] ss:$16 sps:$4 sm:$0xff]   ;;  %v2814_v20 = vld [vmem:[#allocation2 + $0x6c] ss:$16 sps:$4 sm:$0xff]  }
  0x3e   :  { %2599 = vmatmul.mubr.msk.bf16.vlgmr.msra.gmra.mrb[0].mxu1 %vm1286_vm0, %v3372_v10  ;;  %1294 = vmatprep.subr.bf16.mxu0 %v2798_v11  ;;  %v2812_v21 = vld [vmem:[#allocation2 + $0x68] ss:$16 sps:$4 sm:$0xff]   ;;  %v2815_v22 = vld [vmem:[#allocation2 + $0x80] ss:$16 sps:$4 sm:$0xff]   ;;  %v2816_v23 = vld [vmem:[#allocation2 + $0xa4] ss:$16 sps:$4 sm:$0xff]  }
  0x3f   :  { %1455 = vmatpush1.bf16.msra.mxu1 %v2794_v6  ;;  %v2820_v24 = vld [vmem:[#allocation2 + $0x8c] ss:$16 sps:$4 sm:$0xff]   ;;  %v2821_v25 = vld [vmem:[#allocation2 + $0xa0] ss:$16 sps:$4 sm:$0xff]   ;;  %v2818_v26 = vld [vmem:[#allocation2 + $0x88] ss:$16 sps:$4 sm:$0xff]  }
  0x40   :  { %1456 = vmatprep.subr.bf16.mxu1 %v2802_v13  ;;  %v2822_v27 = vld [vmem:[#allocation2 + $0xc4] ss:$16 sps:$4 sm:$0xff]   ;;  %v2826_v28 = vld [vmem:[#allocation2 + $0xac] ss:$16 sps:$4 sm:$0xff]   ;;  %v2824_v29 = vld [vmem:[#allocation2 + $0xa8] ss:$16 sps:$4 sm:$0xff]  }
  0x41   :  { %1295 = vmatpush1.bf16.msra.mxu0 %v2803_v14  ;;  %v2827_v30 = vld [vmem:[#allocation2 + $0xc0] ss:$16 sps:$4 sm:$0xff]   ;;  %v2828_v31 = vld [vmem:[#allocation2 + $0xe4] ss:$16 sps:$4 sm:$0xff]   ;;  %v2832_v32 = vld [vmem:[#allocation2 + $0xcc] ss:$16 sps:$4 sm:$0xff]  }
  0x42   :  { %1296 = vmatprep.subr.bf16.mxu0 %v2804_v15  ;;  %v2833_v33 = vld [vmem:[#allocation2 + $0xe0] ss:$16 sps:$4 sm:$0xff]   ;;  %v2830_v34 = vld [vmem:[#allocation2 + $0xc8] ss:$16 sps:$4 sm:$0xff]   ;;  %v2834_v35 = vld [vmem:[#allocation2 + $0x104] ss:$16 sps:$4 sm:$0xff]  }
  0x43   :  { %1457 = vmatpush1.bf16.msra.mxu1 %v2800_v12  ;;  %v2838_v36 = vld [vmem:[#allocation2 + $0xec] ss:$16 sps:$4 sm:$0xff]   ;;  %v2836_v37 = vld [vmem:[#allocation2 + $0xe8] ss:$16 sps:$4 sm:$0xff]   ;;  %v2839_v38 = vld [vmem:[#allocation2 + $0x100] ss:$16 sps:$4 sm:$0xff]  }
  0x44   :  { %1458 = vmatprep.subr.bf16.mxu1 %v2808_v16  ;;  %v2840_v39 = vld [vmem:[#allocation2 + $0x124] ss:$16 sps:$4 sm:$0xff]   ;;  %v2844_v40 = vld [vmem:[#allocation2 + $0x10c] ss:$16 sps:$4 sm:$0xff]   ;;  %v2845_v41 = vld [vmem:[#allocation2 + $0x120] ss:$16 sps:$4 sm:$0xff]  }
  0x45   :  { %1297 = vmatpush1.bf16.msra.mxu0 %v2809_v17  ;;  %v2842_v42 = vld [vmem:[#allocation2 + $0x108] ss:$16 sps:$4 sm:$0xff]   ;;  %v2846_v43 = vld [vmem:[#allocation2 + $0x144] ss:$16 sps:$4 sm:$0xff]   ;;  %v2850_v44 = vld [vmem:[#allocation2 + $0x12c] ss:$16 sps:$4 sm:$0xff]  }
  0x46   :  { %1298 = vmatprep.subr.bf16.mxu0 %v2810_v19  ;;  %v2848_v45 = vld [vmem:[#allocation2 + $0x128] ss:$16 sps:$4 sm:$0xff]   ;;  %v2851_v46 = vld [vmem:[#allocation2 + $0x140] ss:$16 sps:$4 sm:$0xff]   ;;  %v2852_v47 = vld [vmem:[#allocation2 + $0x164] ss:$16 sps:$4 sm:$0xff]  }
  0x47   :  { %1459 = vmatpush1.bf16.msra.mxu1 %v2806_v18  ;;  %v2856_v48 = vld [vmem:[#allocation2 + $0x14c] ss:$16 sps:$4 sm:$0xff]   ;;  %v2857_v50 = vld [vmem:[#allocation2 + $0x160] ss:$16 sps:$4 sm:$0xff]   ;;  %v2854_v52 = vld [vmem:[#allocation2 + $0x148] ss:$16 sps:$4 sm:$0xff]  }
  0x48   :  { %1460 = vmatprep.subr.bf16.mxu1 %v2814_v20  ;;  %v75_v49 = vld [vmem:[%s3462_s0 + $0x8] sm:$0xff]  ;;  %v2858_v53 = vld [vmem:[#allocation2 + $0x184] ss:$16 sps:$4 sm:$0xff]   ;;  %v2863_v56 = vld [vmem:[#allocation2 + $0x180] ss:$16 sps:$4 sm:$0xff]  }
  0x49   :  { %1299 = vmatpush1.bf16.msra.mxu0 %v2815_v22  ;;  %v82_v51 = vpack.c.bf16 %v75_v49, %v75_v49  ;;  %v2862_v54 = vld [vmem:[#allocation2 + $0x16c] ss:$16 sps:$4 sm:$0xff]   ;;  %v2860_v55 = vld [vmem:[#allocation2 + $0x168] ss:$16 sps:$4 sm:$0xff]   ;;  %v2864_v57 = vld [vmem:[#allocation2 + $0x1a4] ss:$16 sps:$4 sm:$0xff]  }
  0x4a   :  { %1300 = vmatprep.subr.bf16.mxu0 %v2816_v23  ;;  %v2868_v58 = vld [vmem:[#allocation2 + $0x18c] ss:$16 sps:$4 sm:$0xff]   ;;  %v2866_v59 = vld [vmem:[#allocation2 + $0x188] ss:$16 sps:$4 sm:$0xff]   ;;  %v2869_v60 = vld [vmem:[#allocation2 + $0x1a0] ss:$16 sps:$4 sm:$0xff]  }
  0x4b   :  { %1461 = vmatpush1.bf16.msra.mxu1 %v2812_v21  ;;  %1322 = vmatprep.mubr.bf16.mxu0 %v82_v51  ;;  %v2870_v61 = vld [vmem:[#allocation2 + $0x1c4] ss:$16 sps:$4 sm:$0xff]   ;;  %v2874_v62 = vld [vmem:[#allocation2 + $0x1ac] ss:$16 sps:$4 sm:$0xff]   ;;  %v2872_v63 = vld [vmem:[#allocation2 + $0x1a8] ss:$16 sps:$4 sm:$0xff]  }
  0x4c   :  { %1462 = vmatprep.subr.bf16.mxu1 %v2820_v24  ;;  %1486 = vmatprep.mubr.bf16.mxu1 %v82_v51  ;;  %v2875_v1 = vld [vmem:[#allocation2 + $0x1c0] ss:$16 sps:$4 sm:$0xff]   ;;  %v2876_v2 = vld [vmem:[#allocation2 + $0x1e4] ss:$16 sps:$4 sm:$0xff]   ;;  %v2880_v3 = vld [vmem:[#allocation2 + $0x1cc] ss:$16 sps:$4 sm:$0xff]  }
  0x4d   :  { %1301 = vmatpush1.bf16.msra.mxu0 %v2821_v25  ;;  %v2878_v4 = vld [vmem:[#allocation2 + $0x1c8] ss:$16 sps:$4 sm:$0xff]   ;;  %v2881_v5 = vld [vmem:[#allocation2 + $0x1e0] ss:$16 sps:$4 sm:$0xff]   ;;  %v2884_v7 = vld [vmem:[#allocation2 + $0x204] ss:$16 sps:$4 sm:$0xff]  }
  0x4e   :  { %1302 = vmatprep.subr.bf16.mxu0 %v2822_v27  ;;  %v74_v6 = vld [vmem:[%s3462_s0] sm:$0xff]  ;;  %v2887_v8 = vld [vmem:[#allocation2 + $0x1ec] ss:$16 sps:$4 sm:$0xff]   ;;  %v2885_v12 = vld [vmem:[#allocation2 + $0x1e8] ss:$16 sps:$4 sm:$0xff]  }
  0x4f   :  { %1463 = vmatpush1.bf16.msra.mxu1 %v2818_v26  ;;  %v81_v9 = vpack.c.bf16 %v74_v6, %v74_v6  ;;  %v2882_v11 = vld [vmem:[#allocation2 + $0x200] ss:$16 sps:$4 sm:$0xff]   ;;  %v2890_v13 = vld [vmem:[#allocation2 + $0x224] ss:$16 sps:$4 sm:$0xff]   ;;  %v2893_v14 = vld [vmem:[#allocation2 + $0x20c] ss:$16 sps:$4 sm:$0xff]  }
  0x50   :  { %1464 = vmatprep.subr.bf16.mxu1 %v2826_v28  ;;  %v2888_v15 = vld [vmem:[#allocation2 + $0x220] ss:$16 sps:$4 sm:$0xff]   ;;  %v2891_v16 = vld [vmem:[#allocation2 + $0x208] ss:$16 sps:$4 sm:$0xff]   ;;  %v2896_v17 = vld [vmem:[#allocation2 + $0x244] ss:$16 sps:$4 sm:$0xff]  }
  0x51   :  { %1303 = vmatpush1.bf16.msra.mxu0 %v2827_v30  ;;  %v2899_v18 = vld [vmem:[#allocation2 + $0x22c] ss:$16 sps:$4 sm:$0xff]   ;;  %v2894_v19 = vld [vmem:[#allocation2 + $0x240] ss:$16 sps:$4 sm:$0xff]   ;;  %v2897_v20 = vld [vmem:[#allocation2 + $0x228] ss:$16 sps:$4 sm:$0xff]  }
  0x52   :  { %1304 = vmatprep.subr.bf16.mxu0 %v2828_v31  ;;  %v2902_v21 = vld [vmem:[#allocation2 + $0x264] ss:$16 sps:$4 sm:$0xff]   ;;  %v2905_v22 = vld [vmem:[#allocation2 + $0x24c] ss:$16 sps:$4 sm:$0xff]   ;;  %v2900_v23 = vld [vmem:[#allocation2 + $0x260] ss:$16 sps:$4 sm:$0xff]  }
  0x53   :  { %1465 = vmatpush1.bf16.msra.mxu1 %v2824_v29  ;;  %v2903_v24 = vld [vmem:[#allocation2 + $0x248] ss:$16 sps:$4 sm:$0xff]   ;;  %v2908_v25 = vld [vmem:[#allocation2 + $0x284] ss:$16 sps:$4 sm:$0xff]   ;;  %v2911_v26 = vld [vmem:[#allocation2 + $0x26c] ss:$16 sps:$4 sm:$0xff]  }
  0x54   :  { %1466 = vmatprep.subr.bf16.mxu1 %v2832_v32  ;;  %v2906_v27 = vld [vmem:[#allocation2 + $0x280] ss:$16 sps:$4 sm:$0xff]   ;;  %v2909_v28 = vld [vmem:[#allocation2 + $0x268] ss:$16 sps:$4 sm:$0xff]   ;;  %v2914_v29 = vld [vmem:[#allocation2 + $0x2a4] ss:$16 sps:$4 sm:$0xff]  }
  0x55   :  { %1305 = vmatpush1.bf16.msra.mxu0 %v2833_v33  ;;  %v2917_v30 = vld [vmem:[#allocation2 + $0x28c] ss:$16 sps:$4 sm:$0xff]   ;;  %v2912_v31 = vld [vmem:[#allocation2 + $0x2a0] ss:$16 sps:$4 sm:$0xff]   ;;  %v2915_v32 = vld [vmem:[#allocation2 + $0x288] ss:$16 sps:$4 sm:$0xff]  }
  0x56   :  { %1306 = vmatprep.subr.bf16.mxu0 %v2834_v35  ;;  %v2920_v33 = vld [vmem:[#allocation2 + $0x2c4] ss:$16 sps:$4 sm:$0xff]   ;;  %v77_v35 = vld [vmem:[%s3462_s0 + $0x18] sm:$0xff]  ;;  %v2936_v49 = vld [vmem:[#allocation2 + $0x320] ss:$16 sps:$4 sm:$0xff]  }
  0x57   :  { %1467 = vmatpush1.bf16.msra.mxu1 %v2830_v34  ;;  %v2923_v34 = vld [vmem:[#allocation2 + $0x2ac] ss:$16 sps:$4 sm:$0xff]   ;;  %v2944_v51 = vld [vmem:[#allocation2 + $0x344] ss:$16 sps:$4 sm:$0xff]   ;;  %v2966_v6 = vld [vmem:[#allocation2 + $0x3c0] ss:$16 sps:$4 sm:$0xff]  }
  0x58   :  { %1468 = vmatprep.subr.bf16.mxu1 %v2838_v36  ;;  %v84_v36 = vpack.c.bf16 %v77_v35, %v77_v35  ;;  %v3002_v35 = vld [vmem:[#allocation2 + $0x480] ss:$16 sps:$4 sm:$0xff]  }
  0x59   :  { %1307 = vmatpush1.bf16.msra.mxu0 %v2839_v38  ;;  %v2921_v38 = vld [vmem:[#allocation2 + $0x2a8] ss:$16 sps:$4 sm:$0xff]  }
  0x5a   :  { %1308 = vmatprep.subr.bf16.mxu0 %v2840_v39  ;;  %v2926_v39 = vld [vmem:[#allocation2 + $0x2e4] ss:$16 sps:$4 sm:$0xff]  }
  0x5b   :  { %1469 = vmatpush1.bf16.msra.mxu1 %v2836_v37  ;;  %v2918_v37 = vld [vmem:[#allocation2 + $0x2c0] ss:$16 sps:$4 sm:$0xff]  }
  0x5c   :  { %1470 = vmatprep.subr.bf16.mxu1 %v2844_v40  ;;  %v2929_v40 = vld [vmem:[#allocation2 + $0x2cc] ss:$16 sps:$4 sm:$0xff]  }
  0x5d   :  { %1309 = vmatpush1.bf16.msra.mxu0 %v2845_v41  ;;  %v2924_v41 = vld [vmem:[#allocation2 + $0x2e0] ss:$16 sps:$4 sm:$0xff]  }
  0x5e   :  { %1310 = vmatprep.subr.bf16.mxu0 %v2846_v43  ;;  %v2932_v43 = vld [vmem:[#allocation2 + $0x304] ss:$16 sps:$4 sm:$0xff]  }
  0x5f   :  { %1471 = vmatpush1.bf16.msra.mxu1 %v2842_v42  ;;  %v2927_v42 = vld [vmem:[#allocation2 + $0x2c8] ss:$16 sps:$4 sm:$0xff]  }
  0x60   :  { %1472 = vmatprep.subr.bf16.mxu1 %v2850_v44  ;;  %v2935_v44 = vld [vmem:[#allocation2 + $0x2ec] ss:$16 sps:$4 sm:$0xff]  }
  0x61   :  { %1311 = vmatpush1.bf16.msra.mxu0 %v2851_v46  ;;  %v2933_v46 = vld [vmem:[#allocation2 + $0x2e8] ss:$16 sps:$4 sm:$0xff]  }
  0x62   :  { %1312 = vmatprep.subr.bf16.mxu0 %v2852_v47  ;;  %v2938_v47 = vld [vmem:[#allocation2 + $0x324] ss:$16 sps:$4 sm:$0xff]  }
  0x63   :  { %1473 = vmatpush1.bf16.msra.mxu1 %v2848_v45  ;;  %v2930_v45 = vld [vmem:[#allocation2 + $0x300] ss:$16 sps:$4 sm:$0xff]  }
  0x64   :  { %1474 = vmatprep.subr.bf16.mxu1 %v2856_v48  ;;  %v2941_v48 = vld [vmem:[#allocation2 + $0x30c] ss:$16 sps:$4 sm:$0xff]  }
  0x65   :  { %1313 = vmatpush1.bf16.msra.mxu0 %v2857_v50  ;;  %v2939_v50 = vld [vmem:[#allocation2 + $0x308] ss:$16 sps:$4 sm:$0xff]  }
  0x66   :  { %1314 = vmatprep.subr.bf16.mxu0 %v2858_v53  ;;  %v2942_v53 = vld [vmem:[#allocation2 + $0x340] ss:$16 sps:$4 sm:$0xff]  }
  0x67   :  { %1475 = vmatpush1.bf16.msra.mxu1 %v2854_v52  ;;  %v2947_v52 = vld [vmem:[#allocation2 + $0x32c] ss:$16 sps:$4 sm:$0xff]  }
  0x68   :  { %1476 = vmatprep.subr.bf16.mxu1 %v2862_v54  ;;  %v2945_v54 = vld [vmem:[#allocation2 + $0x328] ss:$16 sps:$4 sm:$0xff]  }
  0x69   :  { %1315 = vmatpush1.bf16.msra.mxu0 %v2863_v56  ;;  %v2953_v56 = vld [vmem:[#allocation2 + $0x34c] ss:$16 sps:$4 sm:$0xff]  }
  0x6a   :  { %1316 = vmatprep.subr.bf16.mxu0 %v2864_v57  ;;  %v2948_v57 = vld [vmem:[#allocation2 + $0x360] ss:$16 sps:$4 sm:$0xff]  }
  0x6b   :  { %1477 = vmatpush1.bf16.msra.mxu1 %v2860_v55  ;;  %v2950_v55 = vld [vmem:[#allocation2 + $0x364] ss:$16 sps:$4 sm:$0xff]  }
  0x6c   :  { %1478 = vmatprep.subr.bf16.mxu1 %v2868_v58  ;;  %v2951_v58 = vld [vmem:[#allocation2 + $0x348] ss:$16 sps:$4 sm:$0xff]  }
  0x6d   :  { %1317 = vmatpush1.bf16.msra.mxu0 %v2869_v60  ;;  %v2959_v60 = vld [vmem:[#allocation2 + $0x36c] ss:$16 sps:$4 sm:$0xff]  }
  0x6e   :  { %1318 = vmatprep.subr.bf16.mxu0 %v2870_v61  ;;  %v2954_v61 = vld [vmem:[#allocation2 + $0x380] ss:$16 sps:$4 sm:$0xff]  }
  0x6f   :  { %1479 = vmatpush1.bf16.msra.mxu1 %v2866_v59  ;;  %v2956_v59 = vld [vmem:[#allocation2 + $0x384] ss:$16 sps:$4 sm:$0xff]  }
  0x70   :  { %1480 = vmatprep.subr.bf16.mxu1 %v2874_v62  ;;  %v2957_v62 = vld [vmem:[#allocation2 + $0x368] ss:$16 sps:$4 sm:$0xff]  }
  0x71   :  { %1319 = vmatpush1.bf16.msra.mxu0 %v2875_v1  ;;  %v2965_v1 = vld [vmem:[#allocation2 + $0x38c] ss:$16 sps:$4 sm:$0xff]  }
  0x72   :  { %1320 = vmatprep.subr.bf16.mxu0 %v2876_v2  ;;  %v2960_v2 = vld [vmem:[#allocation2 + $0x3a0] ss:$16 sps:$4 sm:$0xff]  }
  0x73   :  { %1481 = vmatpush1.bf16.msra.mxu1 %v2872_v63  ;;  %v2962_v63 = vld [vmem:[#allocation2 + $0x3a4] ss:$16 sps:$4 sm:$0xff]  }
  0x74   :  { %1482 = vmatprep.subr.bf16.mxu1 %v2880_v3  ;;  %v2963_v3 = vld [vmem:[#allocation2 + $0x388] ss:$16 sps:$4 sm:$0xff]  }
  0x75   :  { %1321 = vmatpush1.bf16.msra.mxu0 %v2881_v5  ;;  %v2971_v5 = vld [vmem:[#allocation2 + $0x3ac] ss:$16 sps:$4 sm:$0xff]  }
  0x76   :  { %1331 = vmatprep.subr.bf16.mxu0 %v2884_v7  ;;  %v2969_v7 = vld [vmem:[#allocation2 + $0x3a8] ss:$16 sps:$4 sm:$0xff]  }
  0x77   :  { %1483 = vmatpush1.bf16.msra.mxu1 %v2878_v4  ;;  %v2968_v4 = vld [vmem:[#allocation2 + $0x3c4] ss:$16 sps:$4 sm:$0xff]  }
  0x78   :  { %1484 = vmatprep.subr.bf16.mxu1 %v2887_v8  ;;  %1323 = vmatmul.mubr.bf16.vlgmr.msra.gmra.mrb[0].mxu0 %v81_v9  ;;  %v2974_v8 = vld [vmem:[#allocation2 + $0x3e4] ss:$16 sps:$4 sm:$0xff]  }
  0x79   :  { %1332 = vmatpush1.bf16.msra.mxu0 %v2882_v11  ;;  %1363 = vmatprep.mubr.bf16.mxu0 %v84_v36  ;;  %v2972_v11 = vld [vmem:[#allocation2 + $0x3e0] ss:$16 sps:$4 sm:$0xff]  }
  0x7a   :  { %1333 = vmatprep.subr.bf16.mxu0 %v2890_v13  ;;  %v2975_v13 = vld [vmem:[#allocation2 + $0x3c8] ss:$16 sps:$4 sm:$0xff]  }
  0x7b   :  { %1485 = vmatpush1.bf16.msra.mxu1 %v2885_v12  ;;  %v76_v12 = vld [vmem:[%s3462_s0 + $0x10] sm:$0xff] }
  0x7c   :  { %1495 = vmatprep.subr.bf16.mxu1 %v2893_v14  ;;  %v2980_v14 = vld [vmem:[#allocation2 + $0x404] ss:$16 sps:$4 sm:$0xff]  }
  0x7d   :  { %1334 = vmatpush1.bf16.msra.mxu0 %v2888_v15  ;;  %v2983_v15 = vld [vmem:[#allocation2 + $0x3ec] ss:$16 sps:$4 sm:$0xff]  }
  0x7e   :  { %1487 = vmatmul.mubr.bf16.vlgmr.msra.gmra.mrb[4].mxu1 %v81_v9  ;;  %1335 = vmatprep.subr.bf16.mxu0 %v2896_v17  ;;  %v2977_v9 = vld [vmem:[#allocation2 + $0x3cc] ss:$16 sps:$4 sm:$0xff]   ;;  %v2978_v17 = vld [vmem:[#allocation2 + $0x400] ss:$16 sps:$4 sm:$0xff]  }
  0x7f   :  { %1496 = vmatpush1.bf16.msra.mxu1 %v2891_v16  ;;  %1527 = vmatprep.mubr.bf16.mxu1 %v84_v36  ;;  %v83_v16 = vpack.c.bf16 %v76_v12, %v76_v12  ;;  %v3005_v36 = vld [vmem:[#allocation2 + $0x468] ss:$16 sps:$4 sm:$0xff]   ;;  %v3067_v12 = vld [vmem:[#allocation2 + $0x5ac] ss:$16 sps:$4 sm:$0xff]  }
  0x80   :  { %1497 = vmatprep.subr.bf16.mxu1 %v2899_v18  ;;  %v2981_v18 = vld [vmem:[#allocation2 + $0x3e8] ss:$16 sps:$4 sm:$0xff]  }
  0x81   :  { %1336 = vmatpush1.bf16.msra.mxu0 %v2894_v19  ;;  %v2986_v19 = vld [vmem:[#allocation2 + $0x424] ss:$16 sps:$4 sm:$0xff]  }
  0x82   :  { %1337 = vmatprep.subr.bf16.mxu0 %v2902_v21  ;;  %v2989_v21 = vld [vmem:[#allocation2 + $0x40c] ss:$16 sps:$4 sm:$0xff]  }
  0x83   :  { %1498 = vmatpush1.bf16.msra.mxu1 %v2897_v20  ;;  %v79_v20 = vld [vmem:[%s3462_s0 + $0x28] sm:$0xff] }
  0x84   :  { %1499 = vmatprep.subr.bf16.mxu1 %v2905_v22  ;;  %v86_v22 = vpack.c.bf16 %v79_v20, %v79_v20  ;;  %v3082_v20 = vld [vmem:[#allocation4 + $0x4] ss:$8 sps:$4 sm:$0xff]  }
  0x85   :  { %1338 = vmatpush1.bf16.msra.mxu0 %v2900_v23  ;;  %v2984_v23 = vld [vmem:[#allocation2 + $0x420] ss:$16 sps:$4 sm:$0xff]  }
  0x86   :  { %1339 = vmatprep.subr.bf16.mxu0 %v2908_v25  ;;  %v2992_v25 = vld [vmem:[#allocation2 + $0x444] ss:$16 sps:$4 sm:$0xff]  }
  0x87   :  { %1500 = vmatpush1.bf16.msra.mxu1 %v2903_v24  ;;  %v2987_v24 = vld [vmem:[#allocation2 + $0x408] ss:$16 sps:$4 sm:$0xff]  }
  0x88   :  { %1501 = vmatprep.subr.bf16.mxu1 %v2911_v26  ;;  %v2995_v26 = vld [vmem:[#allocation2 + $0x42c] ss:$16 sps:$4 sm:$0xff]  }
  0x89   :  { %1340 = vmatpush1.bf16.msra.mxu0 %v2906_v27  ;;  %v2990_v27 = vld [vmem:[#allocation2 + $0x440] ss:$16 sps:$4 sm:$0xff]  }
  0x8a   :  { %1341 = vmatprep.subr.bf16.mxu0 %v2914_v29  ;;  %v2998_v29 = vld [vmem:[#allocation2 + $0x464] ss:$16 sps:$4 sm:$0xff]  }
  0x8b   :  { %1502 = vmatpush1.bf16.msra.mxu1 %v2909_v28  ;;  %v2993_v28 = vld [vmem:[#allocation2 + $0x428] ss:$16 sps:$4 sm:$0xff]  }
  0x8c   :  { %1503 = vmatprep.subr.bf16.mxu1 %v2917_v30  ;;  %v3001_v30 = vld [vmem:[#allocation2 + $0x44c] ss:$16 sps:$4 sm:$0xff]  }
  0x8d   :  { %1342 = vmatpush1.bf16.msra.mxu0 %v2912_v31  ;;  %v2996_v31 = vld [vmem:[#allocation2 + $0x460] ss:$16 sps:$4 sm:$0xff]  }
  0x8e   :  { %1343 = vmatprep.subr.bf16.mxu0 %v2920_v33  ;;  %v3004_v33 = vld [vmem:[#allocation2 + $0x484] ss:$16 sps:$4 sm:$0xff]  }
  0x8f   :  { %1504 = vmatpush1.bf16.msra.mxu1 %v2915_v32  ;;  %v2999_v32 = vld [vmem:[#allocation2 + $0x448] ss:$16 sps:$4 sm:$0xff]  }
  0x90   :  { %1505 = vmatprep.subr.bf16.mxu1 %v2923_v34  ;;  %v3007_v34 = vld [vmem:[#allocation2 + $0x46c] ss:$16 sps:$4 sm:$0xff]  }
  0x91   :  { %1344 = vmatpush1.bf16.msra.mxu0 %v2918_v37  ;;  %v3010_v37 = vld [vmem:[#allocation2 + $0x4a4] ss:$16 sps:$4 sm:$0xff]  }
  0x92   :  { %1345 = vmatprep.subr.bf16.mxu0 %v2926_v39  ;;  %v3008_v39 = vld [vmem:[#allocation2 + $0x4a0] ss:$16 sps:$4 sm:$0xff]  }
  0x93   :  { %1506 = vmatpush1.bf16.msra.mxu1 %v2921_v38  ;;  %v3013_v38 = vld [vmem:[#allocation2 + $0x48c] ss:$16 sps:$4 sm:$0xff]  }
  0x94   :  { %1507 = vmatprep.subr.bf16.mxu1 %v2929_v40  ;;  %v3011_v40 = vld [vmem:[#allocation2 + $0x488] ss:$16 sps:$4 sm:$0xff]  }
  0x95   :  { %1346 = vmatpush1.bf16.msra.mxu0 %v2924_v41  ;;  %v3016_v41 = vld [vmem:[#allocation2 + $0x4c4] ss:$16 sps:$4 sm:$0xff]  }
  0x96   :  { %1347 = vmatprep.subr.bf16.mxu0 %v2932_v43  ;;  %v3014_v43 = vld [vmem:[#allocation2 + $0x4c0] ss:$16 sps:$4 sm:$0xff]  }
  0x97   :  { %1508 = vmatpush1.bf16.msra.mxu1 %v2927_v42  ;;  %v3019_v42 = vld [vmem:[#allocation2 + $0x4ac] ss:$16 sps:$4 sm:$0xff]  }
  0x98   :  { %1509 = vmatprep.subr.bf16.mxu1 %v2935_v44  ;;  %v3017_v44 = vld [vmem:[#allocation2 + $0x4a8] ss:$16 sps:$4 sm:$0xff]  }
  0x99   :  { %1348 = vmatpush1.bf16.msra.mxu0 %v2930_v45  ;;  %v3022_v45 = vld [vmem:[#allocation2 + $0x4e4] ss:$16 sps:$4 sm:$0xff]  }
  0x9a   :  { %1349 = vmatprep.subr.bf16.mxu0 %v2938_v47  ;;  %v3020_v47 = vld [vmem:[#allocation2 + $0x4e0] ss:$16 sps:$4 sm:$0xff]  }
  0x9b   :  { %1510 = vmatpush1.bf16.msra.mxu1 %v2933_v46  ;;  %v3025_v46 = vld [vmem:[#allocation2 + $0x4cc] ss:$16 sps:$4 sm:$0xff]  }
  0x9c   :  { %1511 = vmatprep.subr.bf16.mxu1 %v2941_v48  ;;  %v3023_v48 = vld [vmem:[#allocation2 + $0x4c8] ss:$16 sps:$4 sm:$0xff]  }
  0x9d   :  { %1350 = vmatpush1.bf16.msra.mxu0 %v2936_v49  ;;  %v3028_v49 = vld [vmem:[#allocation2 + $0x504] ss:$16 sps:$4 sm:$0xff]  }
  0x9e   :  { %1351 = vmatprep.subr.bf16.mxu0 %v2944_v51  ;;  %v3026_v51 = vld [vmem:[#allocation2 + $0x500] ss:$16 sps:$4 sm:$0xff]  }
  0x9f   :  { %1512 = vmatpush1.bf16.msra.mxu1 %v2939_v50  ;;  %v3031_v50 = vld [vmem:[#allocation2 + $0x4ec] ss:$16 sps:$4 sm:$0xff]  }
  0xa0   :  { %1513 = vmatprep.subr.bf16.mxu1 %v2947_v52  ;;  %v3029_v52 = vld [vmem:[#allocation2 + $0x4e8] ss:$16 sps:$4 sm:$0xff]  }
  0xa1   :  { %1352 = vmatpush1.bf16.msra.mxu0 %v2942_v53  ;;  %v3034_v53 = vld [vmem:[#allocation2 + $0x524] ss:$16 sps:$4 sm:$0xff]  }
  0xa2   :  { %1353 = vmatprep.subr.bf16.mxu0 %v2950_v55  ;;  %v3032_v55 = vld [vmem:[#allocation2 + $0x520] ss:$16 sps:$4 sm:$0xff]  }
  0xa3   :  { %1514 = vmatpush1.bf16.msra.mxu1 %v2945_v54  ;;  %v3037_v54 = vld [vmem:[#allocation2 + $0x50c] ss:$16 sps:$4 sm:$0xff]  }
  0xa4   :  { %1515 = vmatprep.subr.bf16.mxu1 %v2953_v56  ;;  %v3035_v56 = vld [vmem:[#allocation2 + $0x508] ss:$16 sps:$4 sm:$0xff]  }
  0xa5   :  { %1354 = vmatpush1.bf16.msra.mxu0 %v2948_v57  ;;  %v3040_v57 = vld [vmem:[#allocation2 + $0x544] ss:$16 sps:$4 sm:$0xff]  }
  0xa6   :  { %1355 = vmatprep.subr.bf16.mxu0 %v2956_v59  ;;  %v3038_v59 = vld [vmem:[#allocation2 + $0x540] ss:$16 sps:$4 sm:$0xff]  }
  0xa7   :  { %1516 = vmatpush1.bf16.msra.mxu1 %v2951_v58  ;;  %v3043_v58 = vld [vmem:[#allocation2 + $0x52c] ss:$16 sps:$4 sm:$0xff]  }
  0xa8   :  { %1517 = vmatprep.subr.bf16.mxu1 %v2959_v60  ;;  %v3041_v60 = vld [vmem:[#allocation2 + $0x528] ss:$16 sps:$4 sm:$0xff]  }
  0xa9   :  { %1356 = vmatpush1.bf16.msra.mxu0 %v2954_v61  ;;  %v3046_v61 = vld [vmem:[#allocation2 + $0x564] ss:$16 sps:$4 sm:$0xff]  }
  0xaa   :  { %1357 = vmatprep.subr.bf16.mxu0 %v2962_v63  ;;  %v3044_v63 = vld [vmem:[#allocation2 + $0x560] ss:$16 sps:$4 sm:$0xff]  }
  0xab   :  { %1518 = vmatpush1.bf16.msra.mxu1 %v2957_v62  ;;  %v3049_v62 = vld [vmem:[#allocation2 + $0x54c] ss:$16 sps:$4 sm:$0xff]  }
  0xac   :  { %1519 = vmatprep.subr.bf16.mxu1 %v2965_v1  ;;  %v3047_v1 = vld [vmem:[#allocation2 + $0x548] ss:$16 sps:$4 sm:$0xff]  }
  0xad   :  { %1358 = vmatpush1.bf16.msra.mxu0 %v2960_v2  ;;  %v3052_v2 = vld [vmem:[#allocation2 + $0x584] ss:$16 sps:$4 sm:$0xff]  }
  0xae   :  { %1359 = vmatprep.subr.bf16.mxu0 %v2968_v4  ;;  %v3050_v4 = vld [vmem:[#allocation2 + $0x580] ss:$16 sps:$4 sm:$0xff]  }
  0xaf   :  { %1520 = vmatpush1.bf16.msra.mxu1 %v2963_v3  ;;  %v3055_v3 = vld [vmem:[#allocation2 + $0x56c] ss:$16 sps:$4 sm:$0xff]  }
  0xb0   :  { %1521 = vmatprep.subr.bf16.mxu1 %v2971_v5  ;;  %v3053_v5 = vld [vmem:[#allocation2 + $0x568] ss:$16 sps:$4 sm:$0xff]  }
  0xb1   :  { %1360 = vmatpush1.bf16.msra.mxu0 %v2966_v6  ;;  %v3058_v6 = vld [vmem:[#allocation2 + $0x5a4] ss:$16 sps:$4 sm:$0xff]  }
  0xb2   :  { %1361 = vmatprep.subr.bf16.mxu0 %v2974_v8  ;;  %v3056_v8 = vld [vmem:[#allocation2 + $0x5a0] ss:$16 sps:$4 sm:$0xff]  }
  0xb3   :  { %1522 = vmatpush1.bf16.msra.mxu1 %v2969_v7  ;;  %v3061_v7 = vld [vmem:[#allocation2 + $0x58c] ss:$16 sps:$4 sm:$0xff]  }
  0xb4   :  { %1523 = vmatprep.subr.bf16.mxu1 %v2977_v9  ;;  %v3059_v9 = vld [vmem:[#allocation2 + $0x588] ss:$16 sps:$4 sm:$0xff]  }
  0xb5   :  { %1362 = vmatpush1.bf16.msra.mxu0 %v2972_v11  ;;  %v3064_v11 = vld [vmem:[#allocation2 + $0x5c4] ss:$16 sps:$4 sm:$0xff]  }
  0xb6   :  { %1372 = vmatprep.subr.bf16.mxu0 %v2980_v14  ;;  %v3065_v14 = vld [vmem:[#allocation2 + $0x5a8] ss:$16 sps:$4 sm:$0xff]  }
  0xb7   :  { %1524 = vmatpush1.bf16.msra.mxu1 %v2975_v13  ;;  %v3062_v13 = vld [vmem:[#allocation2 + $0x5c0] ss:$16 sps:$4 sm:$0xff]  }
  0xb8   :  { %1525 = vmatprep.subr.bf16.mxu1 %v2983_v15  ;;  %1364 = vmatmul.mubr.bf16.vlgmr.msra.gmra.mrb[0].mxu0 %v83_v16  ;;  %v3070_v15 = vld [vmem:[#allocation2 + $0x5e4] ss:$16 sps:$4 sm:$0xff]  }
  0xb9   :  { %1373 = vmatpush1.bf16.msra.mxu0 %v2978_v17  ;;  %1404 = vmatprep.mubr.bf16.mxu0 %v86_v22  ;;  %v3068_v17 = vld [vmem:[#allocation2 + $0x5e0] ss:$16 sps:$4 sm:$0xff]  }
  0xba   :  { %1374 = vmatprep.subr.bf16.mxu0 %v2986_v19  ;;  %v3071_v19 = vld [vmem:[#allocation2 + $0x5c8] ss:$16 sps:$4 sm:$0xff]  }
  0xbb   :  { %1526 = vmatpush1.bf16.msra.mxu1 %v2981_v18  ;;  %v78_v18 = vld [vmem:[%s3462_s0 + $0x20] sm:$0xff] }
  0xbc   :  { %1536 = vmatprep.subr.bf16.mxu1 %v2989_v21  ;;  %v3076_v21 = vld [vmem:[#allocation2 + $0x5ec] ss:$16 sps:$4 sm:$0xff]  }
  0xbd   :  { %1375 = vmatpush1.bf16.msra.mxu0 %v2984_v23  ;;  %v3080_v23 = vld [vmem:[#allocation4] ss:$8 sps:$4 sm:$0xff]  }
  0xbe   :  { %1528 = vmatmul.mubr.bf16.vlgmr.msra.gmra.mrb[4].mxu1 %v83_v16  ;;  %1376 = vmatprep.subr.bf16.mxu0 %v2992_v25  ;;  %v3073_v16 = vld [vmem:[#allocation2 + $0x5cc] ss:$16 sps:$4 sm:$0xff]  }
  0xbf   :  { %1537 = vmatpush1.bf16.msra.mxu1 %v2987_v24  ;;  %1568 = vmatprep.mubr.bf16.mxu1 %v86_v22  ;;  %v85_v22 = vpack.c.bf16 %v78_v18, %v78_v18  ;;  %v3074_v24 = vld [vmem:[#allocation2 + $0x5e8] ss:$16 sps:$4 sm:$0xff]   ;;  %v3085_v25 = vld [vmem:[#allocation4 + $0x14] ss:$8 sps:$4 sm:$0xff]  }
  0xc0   :  { %1538 = vmatprep.subr.bf16.mxu1 %v2995_v26  ;;  %v3079_v26 = vld [vmem:[#allocation2 + $0x60c] ss:$16 sps:$4 sm:$0xff]  }
  0xc1   :  { %1377 = vmatpush1.bf16.msra.mxu0 %v2990_v27  ;;  %v3083_v27 = vld [vmem:[#allocation4 + $0x10] ss:$8 sps:$4 sm:$0xff]  }
  0xc2   :  { %1378 = vmatprep.subr.bf16.mxu0 %v2998_v29  ;;  %v3088_v29 = vld [vmem:[#allocation4 + $0x24] ss:$8 sps:$4 sm:$0xff]  }
  0xc3   :  { %1539 = vmatpush1.bf16.msra.mxu1 %v2993_v28  ;;  %v3077_v28 = vld [vmem:[#allocation2 + $0x608] ss:$16 sps:$4 sm:$0xff]  }
  0xc4   :  { %1540 = vmatprep.subr.bf16.mxu1 %v3001_v30  ;;  %v3086_v30 = vld [vmem:[#allocation4 + $0x20] ss:$8 sps:$4 sm:$0xff]  }
  0xc5   :  { %1379 = vmatpush1.bf16.msra.mxu0 %v2996_v31  ;;  %v3091_v31 = vld [vmem:[#allocation4 + $0x34] ss:$8 sps:$4 sm:$0xff]  }
  0xc6   :  { %1380 = vmatprep.subr.bf16.mxu0 %v3004_v33  ;;  %v3094_v33 = vld [vmem:[#allocation4 + $0x44] ss:$8 sps:$4 sm:$0xff]  }
  0xc7   :  { %1541 = vmatpush1.bf16.msra.mxu1 %v2999_v32  ;;  %v3089_v32 = vld [vmem:[#allocation4 + $0x30] ss:$8 sps:$4 sm:$0xff]  }
  0xc8   :  { %1542 = vmatprep.subr.bf16.mxu1 %v3007_v34  ;;  %v3092_v34 = vld [vmem:[#allocation4 + $0x40] ss:$8 sps:$4 sm:$0xff]  }
  0xc9   :  { %1381 = vmatpush1.bf16.msra.mxu0 %v3002_v35  ;;  %v3097_v35 = vld [vmem:[#allocation4 + $0x54] ss:$8 sps:$4 sm:$0xff]  }
  0xca   :  { %1382 = vmatprep.subr.bf16.mxu0 %v3010_v37  ;;  %v3100_v37 = vld [vmem:[#allocation4 + $0x64] ss:$8 sps:$4 sm:$0xff]  }
  0xcb   :  { %1543 = vmatpush1.bf16.msra.mxu1 %v3005_v36  ;;  %v3095_v36 = vld [vmem:[#allocation4 + $0x50] ss:$8 sps:$4 sm:$0xff]  }
  0xcc   :  { %1544 = vmatprep.subr.bf16.mxu1 %v3013_v38  ;;  %v3098_v38 = vld [vmem:[#allocation4 + $0x60] ss:$8 sps:$4 sm:$0xff]  }
  0xcd   :  { %1383 = vmatpush1.bf16.msra.mxu0 %v3008_v39 }
  0xce   :  { %1384 = vmatprep.subr.bf16.mxu0 %v3016_v41  ;;  %v3101_v41 = vld [vmem:[#allocation4 + $0x70] ss:$8 sps:$4 sm:$0xff]  }
  0xcf   :  { %1545 = vmatpush1.bf16.msra.mxu1 %v3011_v40 }
  0xd0   :  { %1546 = vmatprep.subr.bf16.mxu1 %v3019_v42 }
  0xd1   :  { %1385 = vmatpush1.bf16.msra.mxu0 %v3014_v43  ;;  %v3106_v43 = vld [vmem:[#allocation4 + $0x84] ss:$8 sps:$4 sm:$0xff]  }
  0xd2   :  { %1386 = vmatprep.subr.bf16.mxu0 %v3022_v45  ;;  %v3109_v45 = vld [vmem:[#allocation4 + $0x94] ss:$8 sps:$4 sm:$0xff]  }
  0xd3   :  { %1547 = vmatpush1.bf16.msra.mxu1 %v3017_v44 }
  0xd4   :  { %1548 = vmatprep.subr.bf16.mxu1 %v3025_v46  ;;  %v3107_v46 = vld [vmem:[#allocation4 + $0x90] ss:$8 sps:$4 sm:$0xff]  }
  0xd5   :  { %1387 = vmatpush1.bf16.msra.mxu0 %v3020_v47  ;;  %v3112_v47 = vld [vmem:[#allocation4 + $0xa4] ss:$8 sps:$4 sm:$0xff]  }
  0xd6   :  { %1388 = vmatprep.subr.bf16.mxu0 %v3028_v49  ;;  %v3115_v49 = vld [vmem:[#allocation4 + $0xb4] ss:$8 sps:$4 sm:$0xff]  }
  0xd7   :  { %1549 = vmatpush1.bf16.msra.mxu1 %v3023_v48  ;;  %v3110_v48 = vld [vmem:[#allocation4 + $0xa0] ss:$8 sps:$4 sm:$0xff]  }
  0xd8   :  { %1550 = vmatprep.subr.bf16.mxu1 %v3031_v50  ;;  %v3113_v50 = vld [vmem:[#allocation4 + $0xb0] ss:$8 sps:$4 sm:$0xff]  }
  0xd9   :  { %1389 = vmatpush1.bf16.msra.mxu0 %v3026_v51  ;;  %v3118_v51 = vld [vmem:[#allocation4 + $0xc4] ss:$8 sps:$4 sm:$0xff]  }
  0xda   :  { %1390 = vmatprep.subr.bf16.mxu0 %v3034_v53  ;;  %v3121_v53 = vld [vmem:[#allocation4 + $0xd4] ss:$8 sps:$4 sm:$0xff]  }
  0xdb   :  { %1551 = vmatpush1.bf16.msra.mxu1 %v3029_v52  ;;  %v3116_v52 = vld [vmem:[#allocation4 + $0xc0] ss:$8 sps:$4 sm:$0xff]  }
  0xdc   :  { %1552 = vmatprep.subr.bf16.mxu1 %v3037_v54  ;;  %v3119_v54 = vld [vmem:[#allocation4 + $0xd0] ss:$8 sps:$4 sm:$0xff]  }
  0xdd   :  { %1391 = vmatpush1.bf16.msra.mxu0 %v3032_v55  ;;  %v3124_v55 = vld [vmem:[#allocation4 + $0xe4] ss:$8 sps:$4 sm:$0xff]  }
  0xde   :  { %1392 = vmatprep.subr.bf16.mxu0 %v3040_v57  ;;  %v3127_v57 = vld [vmem:[#allocation4 + $0xf4] ss:$8 sps:$4 sm:$0xff]  }
  0xdf   :  { %1553 = vmatpush1.bf16.msra.mxu1 %v3035_v56  ;;  %v3122_v56 = vld [vmem:[#allocation4 + $0xe0] ss:$8 sps:$4 sm:$0xff]  }
  0xe0   :  { %1554 = vmatprep.subr.bf16.mxu1 %v3043_v58  ;;  %v3125_v58 = vld [vmem:[#allocation4 + $0xf0] ss:$8 sps:$4 sm:$0xff]  }
  0xe1   :  { %1393 = vmatpush1.bf16.msra.mxu0 %v3038_v59  ;;  %v3130_v59 = vld [vmem:[#allocation4 + $0x104] ss:$8 sps:$4 sm:$0xff]  }
  0xe2   :  { %1394 = vmatprep.subr.bf16.mxu0 %v3046_v61  ;;  %v3177_v61 = vld [vmem:[#allocation6] sm:$0xff]  }
  0xe3   :  { %1555 = vmatpush1.bf16.msra.mxu1 %v3041_v60  ;;  %v3176_v60 = vld [vmem:[#allocation6 + $0x40] sm:$0xff]  }
  0xe4   :  { %1556 = vmatprep.subr.bf16.mxu1 %v3049_v62  ;;  %v3178_v62 = vld [vmem:[#allocation6 + $0x48] sm:$0xff]  }
  0xe5   :  { %1395 = vmatpush1.bf16.msra.mxu0 %v3044_v63  ;;  %v3179_v63 = vld [vmem:[#allocation6 + $0x8] sm:$0xff]  }
  0xe6   :  { %1396 = vmatprep.subr.bf16.mxu0 %v3052_v2  ;;  %v3181_v2 = vld [vmem:[#allocation6 + $0x10] sm:$0xff]  }
  0xe7   :  { %1557 = vmatpush1.bf16.msra.mxu1 %v3047_v1  ;;  %v3180_v1 = vld [vmem:[#allocation6 + $0x50] sm:$0xff]  }
  0xe8   :  { %1558 = vmatprep.subr.bf16.mxu1 %v3055_v3  ;;  %v3182_v3 = vld [vmem:[#allocation6 + $0x58] sm:$0xff]  }
  0xe9   :  { %1397 = vmatpush1.bf16.msra.mxu0 %v3050_v4  ;;  %v3183_v4 = vld [vmem:[#allocation6 + $0x18] sm:$0xff]  }
  0xea   :  { %1398 = vmatprep.subr.bf16.mxu0 %v3058_v6  ;;  %v3185_v6 = vld [vmem:[#allocation6 + $0x20] sm:$0xff]  }
  0xeb   :  { %1559 = vmatpush1.bf16.msra.mxu1 %v3053_v5  ;;  %v3184_v5 = vld [vmem:[#allocation6 + $0x60] sm:$0xff]  }
  0xec   :  { %1560 = vmatprep.subr.bf16.mxu1 %v3061_v7  ;;  %v3186_v7 = vld [vmem:[#allocation6 + $0x68] sm:$0xff]  }
  0xed   :  { %1399 = vmatpush1.bf16.msra.mxu0 %v3056_v8  ;;  %v3187_v8 = vld [vmem:[#allocation6 + $0x28] sm:$0xff]  }
  0xee   :  { %1400 = vmatprep.subr.bf16.mxu0 %v3064_v11 }
  0xef   :  { %1561 = vmatpush1.bf16.msra.mxu1 %v3059_v9  ;;  %v286_v9 = vlaneseq }
  0xf0   :  { %1562 = vmatprep.subr.bf16.mxu1 %v3067_v12 }
  0xf1   :  { %1401 = vmatpush1.bf16.msra.mxu0 %v3062_v13  ;;  %v3401_v11 = vshrl.u32 %v286_v9, 7  ;;  %v3407_v13 = vld [vmem:[%s3464_s2] sm:$0xf]  ;;  %v3188_v9 = vld [vmem:[#allocation6 + $0x70] sm:$0xff]  }
  0xf2   :  { %1402 = vmatprep.subr.bf16.mxu0 %v3070_v15 }
  0xf3   :  { %1563 = vmatpush1.bf16.msra.mxu1 %v3065_v14  ;;  %v288_v12 = vsub.s32 0, %v3401_v11  ;;  %v292_v14 = vsub.s32 1, %v3401_v11 }
  0xf4   :  { %1564 = vmatprep.subr.bf16.mxu1 %v3073_v16 }
  0xf5   :  { %1403 = vmatpush1.bf16.msra.mxu0 %v3068_v17  ;;  %v289_v15 = vrot.slane %v3407_v13, %v288_v12  ;;  %v293_v16 = vrot.slane %v3407_v13, %v292_v14 }
  0xf6   :  { %2022 = vmatprep.subr.bf16.mxu0 %v3082_v20 }
  0xf7   :  { %1565 = vmatpush1.bf16.msra.mxu1 %v3071_v19 }
  0xf8   :  { %1566 = vmatprep.subr.bf16.mxu1 %v3076_v21  ;;  %1405 = vmatmul.mubr.bf16.vlgmr.msra.gmra.mrb[0].mxu0 %v85_v22 }
  0xf9   :  { %2023 = vmatpush1.bf16.msra.mxu0 %v3080_v23 }
  0xfa   :  { %2024 = vmatprep.subr.bf16.mxu0 %v3085_v25 }
  0xfb   :  { %1567 = vmatpush1.bf16.msra.mxu1 %v3074_v24 }
  0xfc   :  { %1577 = vmatprep.subr.bf16.mxu1 %v3079_v26 }
  0xfd   :  { %2025 = vmatpush1.bf16.msra.mxu0 %v3083_v27 }
  0xfe   :  { %1569 = vmatmul.mubr.bf16.vlgmr.msra.gmra.mrb[4].mxu1 %v85_v22  ;;  %2026 = vmatprep.subr.bf16.mxu0 %v3088_v29 }
  0xff   :  { %1578 = vmatpush1.bf16.msra.mxu1 %v3077_v28  ;;  %1609 = vmatprep.mubr.bf16.mxu1 %v3279_v0  ;;  %v3103_v0 = vld [vmem:[#allocation4 + $0x74] ss:$8 sps:$4 sm:$0xff]   ;;  %v3128_v28 = vld [vmem:[#allocation4 + $0x100] ss:$8 sps:$4 sm:$0xff]  }
 0x100   :  { %2691 = vmatprep.subr.bf16.mxu1 %v3176_v60  ;;  %v3164_v60 = vld [vmem:[#allocation4 + $0x1c0] ss:$8 sps:$4 sm:$0xff]  }
 0x101   :  { %2027 = vmatpush1.bf16.msra.mxu0 %v3086_v30  ;;  %v3133_v30 = vld [vmem:[#allocation4 + $0x114] ss:$8 sps:$4 sm:$0xff]  }
 0x102   :  { %2028 = vmatprep.subr.bf16.mxu0 %v3091_v31  ;;  %v300_v31 = vsub.s32 3, %v3401_v11 }
 0x105   :  { %2029 = vmatpush1.bf16.msra.mxu0 %v3089_v32  ;;  %v3131_v32 = vld [vmem:[#allocation4 + $0x110] ss:$8 sps:$4 sm:$0xff]  }
 0x106   :  { %2030 = vmatprep.subr.bf16.mxu0 %v3094_v33  ;;  %v3136_v33 = vld [vmem:[#allocation4 + $0x124] ss:$8 sps:$4 sm:$0xff]  }
 0x109   :  { %2031 = vmatpush1.bf16.msra.mxu0 %v3092_v34  ;;  %v301_v34 = vrot.slane %v3407_v13, %v300_v31 }
 0x10a   :  { %2600 = vmatmul.mubr.msk.bf16.vlgmr.msra.gmra.mrb[4].mxu1 %vm1286_vm0, %v3372_v10  ;;  %2032 = vmatprep.subr.bf16.mxu0 %v3097_v35  ;;  %v3104_v10 = vld [vmem:[#allocation4 + $0x80] ss:$8 sps:$4 sm:$0xff]  }
 0x10b   :  { %2692 = vmatpush3.bf16.msra.mxu1 %v3177_v61  ;;  %v3134_v35 = vld [vmem:[#allocation4 + $0x120] ss:$8 sps:$4 sm:$0xff]   ;;  %v296_v61 = vsub.s32 2, %v3401_v11 }
 0x10c   :  { %2693 = vmatprep.subr.bf16.mxu1 %v3178_v62  ;;  %v3169_v62 = vld [vmem:[#allocation4 + $0x1d4] ss:$8 sps:$4 sm:$0xff]   ;;  %v3193_v11 = vld [vmem:[%s3469_s7 + $0x8] sm:$0xff]  }
 0x10d   :  { %2033 = vmatpush1.bf16.msra.mxu0 %v3095_v36 }
 0x10e   :  { %2034 = vmatprep.subr.bf16.mxu0 %v3100_v37  ;;  %v3139_v37 = vld [vmem:[#allocation4 + $0x134] ss:$8 sps:$4 sm:$0xff]  }
 0x10f   :  { %2694 = vmatpush3.bf16.msra.mxu1 %v3179_v63  ;;  %v3167_v63 = vld [vmem:[#allocation4 + $0x1d0] ss:$8 sps:$4 sm:$0xff]  }
 0x110   :  { %2695 = vmatprep.subr.bf16.mxu1 %v3180_v1  ;;  %v297_v1 = vrot.slane %v3407_v13, %v296_v61  ;;  %v3191_v13 = vld [vmem:[#allocation6 + $0x38] sm:$0xff]  }
 0x111   :  { %v3397_v39 = vpop.f32.mrb[0].mxu1  ;;  %2035 = vmatpush1.bf16.msra.mxu0 %v3098_v38 }
 0x112   :  { %v3399_v40 = vpop.f32.mrb[1].mxu1  ;;  %2036 = vmatprep.subr.bf16.mxu0 %v3103_v0 }
 0x113   :  { %v1451_v42 = vpop.f32.mrb[2].mxu1  ;;  %2696 = vmatpush3.bf16.msra.mxu1 %v3181_v2  ;;  %v3172_v2 = vld [vmem:[#allocation4 + $0x1e4] ss:$8 sps:$4 sm:$0xff]  }
 0x114   :  { %v1452_v44 = vpop.f32.mrb[3].mxu1  ;;  %2697 = vmatprep.subr.bf16.mxu1 %v3182_v3  ;;  %v3170_v3 = vld [vmem:[#allocation4 + $0x1e0] ss:$8 sps:$4 sm:$0xff]  }
 0x115   :  { %2037 = vmatpush1.bf16.msra.mxu0 %v3101_v41  ;;  %v3137_v41 = vld [vmem:[#allocation4 + $0x130] ss:$8 sps:$4 sm:$0xff]  }
 0x116   :  { %2038 = vmatprep.subr.bf16.mxu0 %v3106_v43  ;;  %v3142_v43 = vld [vmem:[#allocation4 + $0x144] ss:$8 sps:$4 sm:$0xff]  }
 0x117   :  { %2698 = vmatpush3.bf16.msra.mxu1 %v3183_v4 }
 0x118   :  { %2699 = vmatprep.subr.bf16.mxu1 %v3184_v5  ;;  %v3175_v5 = vld [vmem:[#allocation4 + $0x1f4] ss:$8 sps:$4 sm:$0xff]  }
 0x119   :  { %2039 = vmatpush1.bf16.msra.mxu0 %v3104_v10  ;;  %v3140_v10 = vld [vmem:[#allocation4 + $0x140] ss:$8 sps:$4 sm:$0xff]  }
 0x11a   :  { %2040 = vmatprep.subr.bf16.mxu0 %v3109_v45  ;;  %v3145_v45 = vld [vmem:[#allocation4 + $0x154] ss:$8 sps:$4 sm:$0xff]  }
 0x11b   :  { %2700 = vmatpush3.bf16.msra.mxu1 %v3185_v6  ;;  %v3173_v6 = vld [vmem:[#allocation4 + $0x1f0] ss:$8 sps:$4 sm:$0xff]  }
 0x11c   :  { %2701 = vmatprep.subr.bf16.mxu1 %v3186_v7 }
 0x11d   :  { %2041 = vmatpush1.bf16.msra.mxu0 %v3107_v46  ;;  %v3143_v46 = vld [vmem:[#allocation4 + $0x150] ss:$8 sps:$4 sm:$0xff]  }
 0x11e   :  { %2042 = vmatprep.subr.bf16.mxu0 %v3112_v47  ;;  %v3148_v47 = vld [vmem:[#allocation4 + $0x164] ss:$8 sps:$4 sm:$0xff]  }
 0x11f   :  { %2702 = vmatpush3.bf16.msra.mxu1 %v3187_v8 }
 0x120   :  { %2703 = vmatprep.subr.bf16.mxu1 %v3188_v9 }
 0x121   :  { %2043 = vmatpush1.bf16.msra.mxu0 %v3110_v48  ;;  %v3146_v48 = vld [vmem:[#allocation4 + $0x160] ss:$8 sps:$4 sm:$0xff]  }
 0x122   :  { %2044 = vmatprep.subr.bf16.mxu0 %v3115_v49  ;;  %v3151_v49 = vld [vmem:[#allocation4 + $0x174] ss:$8 sps:$4 sm:$0xff]  }
 0x125   :  { %2045 = vmatpush1.bf16.msra.mxu0 %v3113_v50  ;;  %v3149_v50 = vld [vmem:[#allocation4 + $0x170] ss:$8 sps:$4 sm:$0xff]  }
 0x126   :  { %2046 = vmatprep.subr.bf16.mxu0 %v3118_v51  ;;  %v3154_v51 = vld [vmem:[#allocation4 + $0x184] ss:$8 sps:$4 sm:$0xff]  }
 0x129   :  { %2047 = vmatpush1.bf16.msra.mxu0 %v3116_v52  ;;  %v3152_v52 = vld [vmem:[#allocation4 + $0x180] ss:$8 sps:$4 sm:$0xff]  }
 0x12a   :  { %2048 = vmatprep.subr.bf16.mxu0 %v3121_v53  ;;  %v3157_v53 = vld [vmem:[#allocation4 + $0x194] ss:$8 sps:$4 sm:$0xff]  }
 0x12d   :  { %2049 = vmatpush1.bf16.msra.mxu0 %v3119_v54  ;;  %v3155_v54 = vld [vmem:[#allocation4 + $0x190] ss:$8 sps:$4 sm:$0xff]  }
 0x12e   :  { %2050 = vmatprep.subr.bf16.mxu0 %v3124_v55  ;;  %v3160_v55 = vld [vmem:[#allocation4 + $0x1a4] ss:$8 sps:$4 sm:$0xff]  }
 0x131   :  { %2051 = vmatpush1.bf16.msra.mxu0 %v3122_v56  ;;  %v3158_v56 = vld [vmem:[#allocation4 + $0x1a0] ss:$8 sps:$4 sm:$0xff]  }
 0x132   :  { %2052 = vmatprep.subr.bf16.mxu0 %v3127_v57  ;;  %v3163_v57 = vld [vmem:[#allocation4 + $0x1b4] ss:$8 sps:$4 sm:$0xff]  }
 0x135   :  { %2053 = vmatpush1.bf16.msra.mxu0 %v3125_v58  ;;  %v3161_v58 = vld [vmem:[#allocation4 + $0x1b0] ss:$8 sps:$4 sm:$0xff]  }
 0x136   :  { %2063 = vmatprep.subr.bf16.mxu0 %v3130_v59  ;;  %v3166_v59 = vld [vmem:[#allocation4 + $0x1c4] ss:$8 sps:$4 sm:$0xff]  }
 0x1cb   :  { %v1406_v17 = vpop.f32.mrb[0].mxu0 }
 0x1cc   :  { %v2742_v18 = vadd.f32 %v1406_v17, %v289_v15  ;;  %v1408_v19 = vpop.f32.mrb[1].mxu0  ;;  %v3189_v15 = vld [vmem:[#allocation6 + $0x30] sm:$0xff]   ;;  %v3280_v17 = vmov 0.0  }
 0x1cd   :  { %v2744_v20 = vadd.f32 %v1408_v19, %v293_v16  ;;  %v1410_v21 = vpop.f32.mrb[2].mxu0  ;;  %2704 = vmatpush3.bf16.msra.mxu1 %v3189_v15  ;;  %v3190_v16 = vld [vmem:[#allocation6 + $0x78] sm:$0xff]  }
 0x1ce   :  { %v2743_v22 = vadd.f32 %v2742_v18, %v3397_v39  ;;  %v1411_v23 = vpop.f32.mrb[3].mxu0  ;;  %2705 = vmatprep.subr.bf16.mxu1 %v3190_v16  ;;  %v1690_v18 = vld [vmem:[%s3466_s4] sm:$0x3] }
 0x1cf   :  { %v2745_v24 = vadd.f32 %v2744_v20, %v3399_v40  ;;  %v1695_v19 = vrot.slane %v1690_v18, %v288_v12  ;;  %v1699_v20 = vrot.slane %v1690_v18, %v292_v14  ;;  %v3194_v12 = vld [vmem:[%s3469_s7 + $0x10] sm:$0xff]   ;;  %v3195_v14 = vld [vmem:[%s3469_s7 + $0x18] sm:$0xff]  }
 0x1d0   :  { %v1618_v25 = vmax.f32 %v2743_v22, 0.0 }
 0x1d1   :  { %v1619_v26 = vmax.f32 %v2745_v24, 0.0  ;;  %2706 = vmatpush3.bf16.msra.mxu1 %v3191_v13 }
 0x1d2   :  { %v1622_v29 = vpack.c.bf16 %v1618_v25, %v1618_v25  ;;  %2722 = vmatprep.subr.bf16.mxu1 %v3280_v17 }
 0x1d3   :  { %v1623_v27 = vpack.c.bf16 %v1619_v26, %v1619_v26 }
 0x1d5   :  { %2054 = vmatprep.mubr.bf16.mxu0 %v1623_v27 }
 0x1d6   :  { %2055 = vmatmul.mubr.bf16.vlgmr.msra.gmra.mrb[4].mxu0 %v1622_v29 }
 0x1d7   :  { %2064 = vmatpush1.bf16.msra.mxu0 %v3128_v28 }
 0x1d8   :  { %2065 = vmatprep.subr.bf16.mxu0 %v3133_v30  ;;  %v3192_v30 = vld [vmem:[%s3469_s7] sm:$0xff]  }
 0x1db   :  { %2066 = vmatpush1.bf16.msra.mxu0 %v3131_v32  ;;  %v3196_v32 = vld [vmem:[%s3469_s7 + $0x20] sm:$0xff]  }
 0x1dc   :  { %2067 = vmatprep.subr.bf16.mxu0 %v3136_v33  ;;  %v3197_v33 = vld [vmem:[%s3469_s7 + $0x28] sm:$0xff]  }
 0x1dd   :  { %v1611_v36 = vpop.f32.mrb[4].mxu1 }
 0x1de   :  { %v1613_v38 = vpop.f32.mrb[5].mxu1  ;;  %v2746_v4 = vadd.f32 %v1611_v36, %v297_v1 }
 0x1df   :  { %v2747_v0 = vadd.f32 %v1613_v38, %v301_v34  ;;  %v1615_v39 = vpop.f32.mrb[6].mxu1  ;;  %2068 = vmatpush1.bf16.msra.mxu0 %v3134_v35  ;;  %v3198_v34 = vld [vmem:[%s3469_s7 + $0x30] sm:$0xff]   ;;  %v3199_v35 = vld [vmem:[%s3469_s7 + $0x38] sm:$0xff]  }
 0x1e0   :  { %v1616_v40 = vpop.f32.mrb[7].mxu1  ;;  %2069 = vmatprep.subr.bf16.mxu0 %v3139_v37  ;;  %v1620_v7 = vmax.f32 %v2746_v4, 0.0  ;;  %v2665_v37 = vld [vmem:[%s3468_s6] ss:$0 sm:$0xff] }
 0x1e1   :  { %v1621_v42 = vmax.f32 %v2747_v0, 0.0 }
 0x1e2   :  { %v1624_v8 = vpack.c.bf16 %v1620_v7, %v1620_v7 }
 0x1e3   :  { %v1625_v44 = vpack.c.bf16 %v1621_v42, %v1621_v42  ;;  %2070 = vmatpush1.bf16.msra.mxu0 %v3137_v41 }
 0x1e4   :  { %2071 = vmatprep.subr.bf16.mxu0 %v3142_v43 }
 0x1e5   :  { %2095 = vmatprep.mubr.bf16.mxu0 %v1625_v44  ;;  %v2682_v44 = vld [vmem:[%s3470_s8] ss:$0 sm:$0xff] }
 0x1e7   :  { %2072 = vmatpush1.bf16.msra.mxu0 %v3140_v10 }
 0x1e8   :  { %2073 = vmatprep.subr.bf16.mxu0 %v3145_v45 }
 0x1eb   :  { %2074 = vmatpush1.bf16.msra.mxu0 %v3143_v46 }
 0x1ec   :  { %2075 = vmatprep.subr.bf16.mxu0 %v3148_v47 }
 0x1ef   :  { %2076 = vmatpush1.bf16.msra.mxu0 %v3146_v48 }
 0x1f0   :  { %2077 = vmatprep.subr.bf16.mxu0 %v3151_v49 }
 0x1f3   :  { %2078 = vmatpush1.bf16.msra.mxu0 %v3149_v50 }
 0x1f4   :  { %2079 = vmatprep.subr.bf16.mxu0 %v3154_v51 }
 0x1f7   :  { %2080 = vmatpush1.bf16.msra.mxu0 %v3152_v52 }
 0x1f8   :  { %2081 = vmatprep.subr.bf16.mxu0 %v3157_v53 }
 0x1fb   :  { %2082 = vmatpush1.bf16.msra.mxu0 %v3155_v54 }
 0x1fc   :  { %2083 = vmatprep.subr.bf16.mxu0 %v3160_v55 }
 0x1ff   :  { %2084 = vmatpush1.bf16.msra.mxu0 %v3158_v56 }
 0x200   :  { %2085 = vmatprep.subr.bf16.mxu0 %v3163_v57 }
 0x203   :  { %2086 = vmatpush1.bf16.msra.mxu0 %v3161_v58 }
 0x204   :  { %2087 = vmatprep.subr.bf16.mxu0 %v3166_v59 }
 0x207   :  { %2088 = vmatpush1.bf16.msra.mxu0 %v3164_v60 }
 0x208   :  { %2089 = vmatprep.subr.bf16.mxu0 %v3169_v62 }
 0x20b   :  { %2090 = vmatpush1.bf16.msra.mxu0 %v3167_v63 }
 0x20c   :  { %2091 = vmatprep.subr.bf16.mxu0 %v3172_v2 }
 0x20f   :  { %2092 = vmatpush1.bf16.msra.mxu0 %v3170_v3 }
 0x210   :  { %2093 = vmatprep.subr.bf16.mxu0 %v3175_v5 }
 0x213   :  { %2094 = vmatpush1.bf16.msra.mxu0 %v3173_v6 }
 0x216   :  { %2096 = vmatmul.mubr.bf16.vlgmr.msra.gmra.mrb[4].mxu0 %v1624_v8 }
 0x2e9   :  { %v2097_v21 = vpop.f32.mrb[4].mxu0 }
 0x2ea   :  { %v2748_v22 = vadd.f32 %v2097_v21, %v1695_v19  ;;  %v2099_v23 = vpop.f32.mrb[5].mxu0 }
 0x2eb   :  { %v2749_v24 = vadd.f32 %v2099_v23, %v1699_v20  ;;  %v2101_v25 = vpop.f32.mrb[6].mxu0 }
 0x2ec   :  { %v2104_v26 = vmax.f32 %v2748_v22, 0.0  ;;  %v2102_v27 = vpop.f32.mrb[7].mxu0 }
 0x2ed   :  { %v2105_v28 = vmax.f32 %v2749_v24, 0.0 }
 0x2ee   :  { %v2106_v31 = vpack.c.bf16 %v2104_v26, %v2104_v26 }
 0x2ef   :  { %v2107_v29 = vpack.c.bf16 %v2105_v28, %v2105_v28 }
 0x2f1   :  { %2275 = vmatprep.mubr.bf16.mxu1 %v2107_v29 }
 0x2f2   :  { %2276 = vmatmul.mubr.bf16.vlgmr.msra.gmra.mrb[8].mxu1 %v2106_v31 }
 0x2f3   :  { %2723 = vmatpush3.bf16.msra.mxu1 %v3192_v30  ;;  %2738 = vmatprep.mubr.msk.bf16.mxu1 %vm3281_vm1, %v3280_v17 }
 0x2f4   :  { %2724 = vmatprep.subr.bf16.mxu1 %v3280_v17 }
 0x2f7   :  { %2725 = vmatpush3.bf16.msra.mxu1 %v3193_v11 }
 0x2f8   :  { %2726 = vmatprep.subr.bf16.mxu1 %v3280_v17 }
 0x2fb   :  { %2727 = vmatpush3.bf16.msra.mxu1 %v3194_v12 }
 0x2fc   :  { %2728 = vmatprep.subr.bf16.mxu1 %v3280_v17 }
 0x2ff   :  { %2729 = vmatpush3.bf16.msra.mxu1 %v3195_v14 }
 0x300   :  { %2730 = vmatprep.subr.bf16.mxu1 %v3280_v17 }
 0x303   :  { %2731 = vmatpush3.bf16.msra.mxu1 %v3196_v32 }
 0x304   :  { %2732 = vmatprep.subr.bf16.mxu1 %v3280_v17 }
 0x307   :  { %2733 = vmatpush3.bf16.msra.mxu1 %v3197_v33 }
 0x308   :  { %2734 = vmatprep.subr.bf16.mxu1 %v3280_v17 }
 0x30b   :  { %2735 = vmatpush3.bf16.msra.mxu1 %v3198_v34 }
 0x30c   :  { %2736 = vmatprep.subr.bf16.mxu1 %v3280_v17 }
 0x30f   :  { %2737 = vmatpush3.bf16.msra.mxu1 %v3199_v35 }
 0x3c5   :  { %v2707_v36 = vpop.f32.mrb[8].mxu1 }
 0x3c6   :  { %v2708_v38 = vpop.f32.mrb[9].mxu1 }
 0x3c7   :  { %v2709_v0 = vadd.f32 %v2708_v38, %v2707_v36  ;;  %v2710_v39 = vpop.f32.mrb[10].mxu1 }
 0x3c8   :  { %v2711_v40 = vpop.f32.mrb[11].mxu1 }
 0x3c9   :  { %v2278_v41 = vadd.f32 %v2709_v0, %v2665_v37 }
 0x3cb   :  { %v2283_v42 = vmax.f32 %v2278_v41, 0.0 }
 0x3cd   :  { %v2284_v43 = vpack.c.bf16 %v2283_v42, %v2283_v42 }
 0x3cf   :  { %2739 = vmatmul.mubr.bf16.vlgmr.msra.gmra.mrb[12].mxu1 %v2284_v43 }
 0x4a2   :  { %v2390_v10 = vpop.f32.mrb[12].mxu1 }
 0x4a3   :  { %v2391_v45 = vadd.f32 %v2682_v44, %v2390_v10  ;;  %v2740_v46 = vpop.f32.mrb[13].mxu1 }
 0x4a4   :  { %v2393_v47 = vpop.f32.mrb[14].mxu1 }
 0x4a5   :  { %2396 = vst [vmem:[%s3471_s9] sm:$0xff] %v2391_v45  ;;  %v2741_v48 = vpop.f32.mrb[15].mxu1 }
 0x4a6   :  { %2401 = vsyncpa [#allocation3], 1 }
 0x4a7   :  { %2402 = vsyncpa [#allocation5], 1 }

</bundles_post_ra>
